<compile_context>
chip_gen: v7x
topology: tpu7x:2x2x1
jax: 0.10.0
libtpu: 0.0.40
codegen_flags: <defaults>
</compile_context>

<pallas_src>
import functools
import numpy as np
import jax
import jax.numpy as jnp
from jax.experimental import pallas as pl
from jax.experimental.pallas import tpu as pltpu

PAD = 0  # Constants.PAD
NEG_BIG = -1e9  # finite "minus infinity" for masking (avoids NaN on fully-masked rows)


# ----------------------------- glue (plain JAX / numpy) -----------------------------

def get_sinusoid_encoding_table(n_position, d_hid, padding_idx=None):
    def cal_angle(position, hid_idx):
        return position / np.power(10000, 2 * (hid_idx // 2) / d_hid)

    def get_posi_angle_vec(position):
        return [cal_angle(position, hid_j) for hid_j in range(d_hid)]

    table = np.array([get_posi_angle_vec(p) for p in range(n_position)])
    table[:, 0::2] = np.sin(table[:, 0::2])
    table[:, 1::2] = np.cos(table[:, 1::2])
    if padding_idx is not None:
        table[padding_idx] = 0.0
    return jnp.asarray(table, dtype=jnp.float32)


# packed small-vector rows (one DMA for all biases + LN params)
ROW_QKV_B, ROW_FC_B, ROW_LN1G, ROW_LN1B, ROW_B1, ROW_B2, ROW_LN2G, ROW_LN2B = range(8)


def pack_vecs(rows):
    width = max(int(r.shape[0]) for r in rows)
    packed = jnp.zeros((len(rows), width), jnp.float32)
    for i, r in enumerate(rows):
        packed = packed.at[i, : r.shape[0]].set(r)
    return packed


# ----------------------------- Pallas encoder-layer kernel -----------------------------

def encoder_layer_kernel(x_ref, kbias_ref, npad_ref,
                         wqkv_ref, fcw_ref, w1_ref, w2_ref, vec_ref,
                         out_ref, *, n_head, d_k, d_v):
    x = x_ref[0]          # (L, D)   f32 activations
    kbias = kbias_ref[0]  # (1, L)   additive key bias: 0 (valid) or -1e9 (PAD)
    npad = npad_ref[0]    # (L, 1)   1.0 where query position is not PAD

    D = x.shape[-1]
    d_inner = w1_ref.shape[1]
    hdk = n_head * d_k
    hdv = n_head * d_v
    qkv_dim = 2 * hdk + hdv

    residual = x
    x_bf = x.astype(jnp.bfloat16)

    # --- fused QKV projection: one MXU pass (bf16 in, f32 accumulate) ---
    qkv = jnp.dot(x_bf, wqkv_ref[...], preferred_element_type=jnp.float32)
    qkv = qkv + vec_ref[ROW_QKV_B:ROW_QKV_B + 1, :qkv_dim]

    inv_temp = 1.0 / float(np.sqrt(d_k))
    q_all = (qkv[:, :hdk] * inv_temp).astype(jnp.bfloat16)          # temperature folded into Q
    k_all = qkv[:, hdk:2 * hdk].astype(jnp.bfloat16)
    v_all = qkv[:, 2 * hdk:qkv_dim].astype(jnp.bfloat16)

    # --- multi-head attention: static unroll over heads, softmax in f32 ---
    heads = []
    for h in range(n_head):
        qh = q_all[:, h * d_k:(h + 1) * d_k]
        kh = k_all[:, h * d_k:(h + 1) * d_k]
        vh = v_all[:, h * d_v:(h + 1) * d_v]
        s = jnp.dot(qh, kh.T, preferred_element_type=jnp.float32) + kbias   # (L, L)
        s = s - jnp.max(s, axis=-1, keepdims=True)
        p = jnp.exp(s)
        attn = p * pl.reciprocal(jnp.sum(p, axis=-1, keepdims=True), approx=True)
        heads.append(jnp.dot(attn.astype(jnp.bfloat16), vh,
                             preferred_element_type=jnp.float32))           # (L, d_v)

    # fused output projection: one lane-dense (L, H*dv) slab, ONE matmul with full fc weight
    o = jnp.concatenate(heads, axis=-1)                                     # (L, H*dv)
    mha = jnp.dot(o.astype(jnp.bfloat16), fcw_ref[...],
                  preferred_element_type=jnp.float32) + vec_ref[ROW_FC_B:ROW_FC_B + 1, :D]

    # residual + post-LN (f32), then non-pad mask
    y = mha + residual
    mu = jnp.mean(y, axis=-1, keepdims=True)
    var = jnp.mean(jnp.square(y - mu), axis=-1, keepdims=True)
    y = ((y - mu) * jax.lax.rsqrt(var + 1e-5)
         * vec_ref[ROW_LN1G:ROW_LN1G + 1, :D] + vec_ref[ROW_LN1B:ROW_LN1B + 1, :D])
    y = y * npad  # enc_output *= non_pad_mask

    # --- position-wise feed forward (Conv1d kernel-size 1 == Linear) ---
    h1 = jnp.dot(y.astype(jnp.bfloat16), w1_ref[...],
                 preferred_element_type=jnp.float32) + vec_ref[ROW_B1:ROW_B1 + 1, :d_inner]
    h1 = jnp.maximum(h1, 0.0)
    h2 = jnp.dot(h1.astype(jnp.bfloat16), w2_ref[...],
                 preferred_element_type=jnp.float32) + vec_ref[ROW_B2:ROW_B2 + 1, :D]
    z = h2 + y
    mu2 = jnp.mean(z, axis=-1, keepdims=True)
    var2 = jnp.mean(jnp.square(z - mu2), axis=-1, keepdims=True)
    z = ((z - mu2) * jax.lax.rsqrt(var2 + 1e-5)
         * vec_ref[ROW_LN2G:ROW_LN2G + 1, :D] + vec_ref[ROW_LN2B:ROW_LN2B + 1, :D])
    z = z * npad  # enc_output *= non_pad_mask

    out_ref[0] = z.astype(out_ref.dtype)


def encoder_layer_pallas(x, kbias, npad, lp, *, n_head, d_k, d_v):
    """One EncoderLayer forward (dropout = identity, i.e. eval mode)."""
    B, L, D = x.shape
    wqkv, fcw, w1, w2, vecs = lp["wqkv"], lp["fcw"], lp["w1"], lp["w2"], lp["vecs"]

    in_specs = [
        pl.BlockSpec((1, L, D), lambda b: (b, 0, 0)),   # activations
        pl.BlockSpec((1, 1, L), lambda b: (b, 0, 0)),   # additive key-pad bias row
        pl.BlockSpec((1, L, 1), lambda b: (b, 0, 0)),   # non-pad query mask
        pl.BlockSpec(wqkv.shape, lambda b: (0, 0)),     # fused QKV weight (bf16)
        pl.BlockSpec(fcw.shape, lambda b: (0, 0)),      # output-projection weight (bf16)
        pl.BlockSpec(w1.shape, lambda b: (0, 0)),       # FFN weight 1 (bf16)
        pl.BlockSpec(w2.shape, lambda b: (0, 0)),       # FFN weight 2 (bf16)
        pl.BlockSpec(vecs.shape, lambda b: (0, 0)),     # packed biases / LN params (f32)
    ]
    # NOTE(v7x): for production d_model/d_inner, single-buffer the grid-invariant weight
    # BlockSpecs (pipeline_mode=pl.Buffered(1)) and/or raise vmem_limit_bytes; at these
    # shapes the default budget is ample.

    kernel = functools.partial(encoder_layer_kernel, n_head=n_head, d_k=d_k, d_v=d_v)
    return pl.pallas_call(
        kernel,
        out_shape=jax.ShapeDtypeStruct((B, L, D), jnp.float32),
        grid_spec=pltpu.PrefetchScalarGridSpec(
            num_scalar_prefetch=0,
            grid=(B,),
            in_specs=in_specs,
            out_specs=pl.BlockSpec((1, L, D), lambda b: (b, 0, 0)),
        ),
        compiler_params=pltpu.CompilerParams(dimension_semantics=("parallel",)),
    )(x, kbias, npad, wqkv, fcw, w1, w2, vecs)


# ----------------------------- full module forward -----------------------------

def encoder_answerfeature_forward(src_seq, src_pos, ans_seq, ans_pos, params,
                                  *, n_head, d_k, d_v):
    del ans_pos  # unused in the reference forward
    B, L = src_seq.shape

    # masks: only O(B*L) data crosses HBM->VMEM (no dense (B, L, L) mask)
    key_pad = (src_seq == PAD).astype(jnp.float32)          # (B, L)
    kbias = (key_pad * NEG_BIG)[:, None, :]                 # (B, 1, L) additive bias
    npad = (1.0 - key_pad)[:, :, None]                      # (B, L, 1) non-pad mask

    # embeddings (glue: gather lookups)
    enc = (jnp.take(params["word_emb"], src_seq, axis=0)
           + jnp.take(params["pos_emb"], src_pos, axis=0)
           + jnp.take(params["tok_emb"], ans_seq, axis=0)).astype(jnp.float32)

    for lp in params["layers"]:
        enc = encoder_layer_pallas(enc, kbias, npad, lp,
                                   n_head=n_head, d_k=d_k, d_v=d_v)
    return (enc,)


# ----------------------------- deterministic parameter init -----------------------------

def init_params(key, *, n_src_vocab, len_max_seq, d_word_vec, n_layers,
                n_head, d_k, d_v, d_model, d_inner):
    n_position = len_max_seq + 1
    keys = jax.random.split(key, 2 + 6 * n_layers)
    it = iter(keys)

    word_emb = 0.02 * jax.random.normal(next(it), (n_src_vocab, d_word_vec), jnp.float32)
    word_emb = word_emb.at[PAD].set(0.0)                     # padding_idx=PAD
    pos_emb = get_sinusoid_encoding_table(n_position, d_word_vec, padding_idx=0)
    tok_emb = 0.02 * jax.random.normal(next(it), (2, d_word_vec), jnp.float32)
    tok_emb = tok_emb.at[0].set(0.0)                         # padding_idx=0

    layers = []
    for _ in range(n_layers):
        wq = 0.05 * jax.random.normal(next(it), (d_model, n_head * d_k), jnp.float32)
        wk = 0.05 * jax.random.normal(next(it), (d_model, n_head * d_k), jnp.float32)
        wv = 0.05 * jax.random.normal(next(it), (d_model, n_head * d_v), jnp.float32)
        fcw = 0.05 * jax.random.normal(next(it), (n_head * d_v, d_model), jnp.float32)
        w1 = 0.05 * jax.random.normal(next(it), (d_model, d_inner), jnp.float32)
        w2 = 0.05 * jax.random.normal(next(it), (d_inner, d_model), jnp.float32)

        bq = jnp.zeros((n_head * d_k,), jnp.float32)
        bk = jnp.zeros((n_head * d_k,), jnp.float32)
        bv = jnp.zeros((n_head * d_v,), jnp.float32)
        fcb = jnp.zeros((d_model,), jnp.float32)
        ln1g = jnp.ones((d_model,), jnp.float32)
        ln1b = jnp.zeros((d_model,), jnp.float32)
        b1 = jnp.zeros((d_inner,), jnp.float32)
        b2 = jnp.zeros((d_model,), jnp.float32)
        ln2g = jnp.ones((d_model,), jnp.float32)
        ln2b = jnp.zeros((d_model,), jnp.float32)

        layers.append({
            # bf16 weights (halve DMA bytes / VMEM residency); matmuls accumulate in f32
            "wqkv": jnp.concatenate([wq, wk, wv], axis=1).astype(jnp.bfloat16),
            "fcw": fcw.astype(jnp.bfloat16),
            "w1": w1.astype(jnp.bfloat16),
            "w2": w2.astype(jnp.bfloat16),
            # all small vectors packed into one array -> one DMA per grid step
            "vecs": pack_vecs([jnp.concatenate([bq, bk, bv]),
                               fcb, ln1g, ln1b, b1, b2, ln2g, ln2b]),
        })

    return {"word_emb": word_emb, "pos_emb": pos_emb, "tok_emb": tok_emb, "layers": layers}


# ----------------------------- main -----------------------------

if __name__ == "__main__":
    # small but lane/sublane-aligned shapes (D multiple of 128, L multiple of 8)
    B, L = 2, 16
    n_src_vocab, len_max_seq = 32, 16
    d_word_vec = d_model = 128
    n_layers, n_head, d_k, d_v, d_inner = 2, 4, 32, 32, 256

    key = jax.random.PRNGKey(0)
    pkey, skey, akey = jax.random.split(key, 3)
    params = init_params(pkey, n_src_vocab=n_src_vocab, len_max_seq=len_max_seq,
                         d_word_vec=d_word_vec, n_layers=n_layers, n_head=n_head,
                         d_k=d_k, d_v=d_v, d_model=d_model, d_inner=d_inner)

    # src_seq: row 0 fully populated, row 1 has 4 trailing PADs
    tok = jax.random.randint(skey, (B, L), 1, n_src_vocab)
    valid = jnp.array([[1] * L, [1] * (L - 4) + [0] * 4], dtype=jnp.int32)
    src_seq = tok * valid                                               # PAD = 0
    src_pos = (jnp.arange(1, L + 1, dtype=jnp.int32)[None, :] * valid)  # 0 at pads
    ans_seq = jax.random.randint(akey, (B, L), 0, 2) * valid            # token types {0,1}
    ans_pos = src_pos                                                   # unused

    (enc_out,) = encoder_answerfeature_forward(
        src_seq, src_pos, ans_seq, ans_pos, params,
        n_head=n_head, d_k=d_k, d_v=d_v)
    enc_out = jax.block_until_ready(enc_out)

    assert enc_out.shape == (B, L, d_model)
    assert bool(jnp.all(jnp.isfinite(enc_out)))
    # padded query positions must be zeroed by non_pad_mask
    assert float(jnp.max(jnp.abs(enc_out[1, L - 4:, :]))) == 0.0
    print("KERNEL_OK")
</pallas_src>

<mosaic_0001>
module attributes {stable_mosaic.version = 11 : i64} {
  func.func @encoder_layer_kernel(%arg0: i32, %arg1: memref<1x16x128xf32, #tpu.memory_space<vmem>>, %arg2: memref<1x1x16xf32, #tpu.memory_space<vmem>>, %arg3: memref<1x16x1xf32, #tpu.memory_space<vmem>>, %arg4: memref<128x384xbf16, #tpu.memory_space<vmem>>, %arg5: memref<128x128xbf16, #tpu.memory_space<vmem>>, %arg6: memref<128x256xbf16, #tpu.memory_space<vmem>>, %arg7: memref<256x128xbf16, #tpu.memory_space<vmem>>, %arg8: memref<8x384xf32, #tpu.memory_space<vmem>>, %arg9: memref<1x16x128xf32, #tpu.memory_space<vmem>>) attributes {dimension_semantics = [#tpu.dimension_semantics<parallel>], iteration_bounds = array<i64: 2>, scalar_prefetch = 0 : i64, scratch_operands = 0 : i64, tpu.core_type = #tpu.core_type<tc>, window_params = [{transform_indices = @transform_0, window_bounds = array<i64: 1, 16, 128>}, {transform_indices = @transform_1, window_bounds = array<i64: 1, 1, 16>}, {transform_indices = @transform_2, window_bounds = array<i64: 1, 16, 1>}, {pipeline_mode = #tpu.pipeline_mode<synchronous>, transform_indices = @transform_3, window_bounds = array<i64: 128, 384>}, {pipeline_mode = #tpu.pipeline_mode<synchronous>, transform_indices = @transform_4, window_bounds = array<i64: 128, 128>}, {pipeline_mode = #tpu.pipeline_mode<synchronous>, transform_indices = @transform_5, window_bounds = array<i64: 128, 256>}, {pipeline_mode = #tpu.pipeline_mode<synchronous>, transform_indices = @transform_6, window_bounds = array<i64: 256, 128>}, {pipeline_mode = #tpu.pipeline_mode<synchronous>, transform_indices = @transform_7, window_bounds = array<i64: 8, 384>}, {transform_indices = @transform_8, window_bounds = array<i64: 1, 16, 128>}]} {
    %c0 = arith.constant 0 : index
    %c0_0 = arith.constant 0 : index
    %c0_1 = arith.constant 0 : index
    %0 = vector.load %arg1[%c0, %c0_0, %c0_1] : memref<1x16x128xf32, #tpu.memory_space<vmem>>, vector<1x16x128xf32>
    %1 = vector.shape_cast %0 : vector<1x16x128xf32> to vector<16x128xf32>
    %c0_2 = arith.constant 0 : index
    %c0_3 = arith.constant 0 : index
    %c0_4 = arith.constant 0 : index
    %2 = vector.load %arg2[%c0_2, %c0_3, %c0_4] : memref<1x1x16xf32, #tpu.memory_space<vmem>>, vector<1x1x16xf32>
    %3 = vector.shape_cast %2 : vector<1x1x16xf32> to vector<1x16xf32>
    %c0_5 = arith.constant 0 : index
    %c0_6 = arith.constant 0 : index
    %c0_7 = arith.constant 0 : index
    %4 = vector.load %arg3[%c0_5, %c0_6, %c0_7] : memref<1x16x1xf32, #tpu.memory_space<vmem>>, vector<1x16x1xf32>
    %5 = vector.shape_cast %4 : vector<1x16x1xf32> to vector<16x1xf32>
    %6 = arith.truncf %1 : vector<16x128xf32> to vector<16x128xbf16>
    %c0_8 = arith.constant 0 : index
    %c0_9 = arith.constant 0 : index
    %7 = vector.load %arg4[%c0_8, %c0_9] : memref<128x384xbf16, #tpu.memory_space<vmem>>, vector<128x384xbf16>
    %cst = arith.constant dense<0.000000e+00> : vector<16x384xf32>
    %8 = tpu.matmul %6, %7, %cst {dimension_numbers = #tpu.dot_dimension_numbers<[1], [0], [0], [1], [0, 0, 1, 1], [], []>} : vector<16x128xbf16>, vector<128x384xbf16>, vector<16x384xf32> -> vector<16x384xf32>
    %c0_10 = arith.constant 0 : index
    %c0_11 = arith.constant 0 : index
    %9 = vector.load %arg8[%c0_10, %c0_11] : memref<8x384xf32, #tpu.memory_space<vmem>>, vector<1x384xf32>
    %10 = vector.broadcast %9 : vector<1x384xf32> to vector<16x384xf32>
    %11 = arith.addf %8, %10 : vector<16x384xf32>
    %12 = vector.extract_strided_slice %11 {offsets = [0, 0], sizes = [16, 128], strides = [1, 1]} : vector<16x384xf32> to vector<16x128xf32>
    %cst_12 = arith.constant 0.176776692 : f32
    %13 = vector.broadcast %cst_12 : f32 to vector<16x128xf32>
    %14 = arith.mulf %12, %13 : vector<16x128xf32>
    %15 = arith.truncf %14 : vector<16x128xf32> to vector<16x128xbf16>
    %16 = vector.extract_strided_slice %11 {offsets = [0, 128], sizes = [16, 128], strides = [1, 1]} : vector<16x384xf32> to vector<16x128xf32>
    %17 = arith.truncf %16 : vector<16x128xf32> to vector<16x128xbf16>
    %18 = vector.extract_strided_slice %11 {offsets = [0, 256], sizes = [16, 128], strides = [1, 1]} : vector<16x384xf32> to vector<16x128xf32>
    %19 = arith.truncf %18 : vector<16x128xf32> to vector<16x128xbf16>
    %20 = vector.extract_strided_slice %15 {offsets = [0, 0], sizes = [16, 32], strides = [1, 1]} : vector<16x128xbf16> to vector<16x32xbf16>
    %21 = vector.extract_strided_slice %17 {offsets = [0, 0], sizes = [16, 32], strides = [1, 1]} : vector<16x128xbf16> to vector<16x32xbf16>
    %22 = vector.extract_strided_slice %19 {offsets = [0, 0], sizes = [16, 32], strides = [1, 1]} : vector<16x128xbf16> to vector<16x32xbf16>
    %23 = tpu.transpose %21, [1, 0] : vector<16x32xbf16> -> vector<32x16xbf16>
    %cst_13 = arith.constant dense<0.000000e+00> : vector<16x16xf32>
    %24 = tpu.matmul %20, %23, %cst_13 {dimension_numbers = #tpu.dot_dimension_numbers<[1], [0], [0], [1], [0, 0, 1, 1], [], []>} : vector<16x32xbf16>, vector<32x16xbf16>, vector<16x16xf32> -> vector<16x16xf32>
    %25 = vector.broadcast %3 : vector<1x16xf32> to vector<16x16xf32>
    %26 = arith.addf %24, %25 : vector<16x16xf32>
    %cst_14 = arith.constant dense<0xFF800000> : vector<16xf32>
    %27 = vector.multi_reduction <maximumf>, %26, %cst_14 [1] : vector<16x16xf32> to vector<16xf32>
    %28 = vector.shape_cast %27 : vector<16xf32> to vector<16x1xf32>
    %29 = vector.broadcast %28 : vector<16x1xf32> to vector<16x16xf32>
    %30 = arith.subf %26, %29 : vector<16x16xf32>
    %31 = math.exp %30 : vector<16x16xf32>
    %cst_15 = arith.constant dense<0.000000e+00> : vector<16xf32>
    %32 = vector.multi_reduction <add>, %31, %cst_15 [1] : vector<16x16xf32> to vector<16xf32>
    %33 = vector.shape_cast %32 : vector<16xf32> to vector<16x1xf32>
    %34 = tpu.reciprocal %33 {approx = true} : vector<16x1xf32> -> vector<16x1xf32>
    %35 = vector.broadcast %34 : vector<16x1xf32> to vector<16x16xf32>
    %36 = arith.mulf %31, %35 : vector<16x16xf32>
    %37 = arith.truncf %36 : vector<16x16xf32> to vector<16x16xbf16>
    %cst_16 = arith.constant dense<0.000000e+00> : vector<16x32xf32>
    %38 = tpu.matmul %37, %22, %cst_16 {dimension_numbers = #tpu.dot_dimension_numbers<[1], [0], [0], [1], [0, 0, 1, 1], [], []>} : vector<16x16xbf16>, vector<16x32xbf16>, vector<16x32xf32> -> vector<16x32xf32>
    %39 = vector.extract_strided_slice %15 {offsets = [0, 32], sizes = [16, 32], strides = [1, 1]} : vector<16x128xbf16> to vector<16x32xbf16>
    %40 = vector.extract_strided_slice %17 {offsets = [0, 32], sizes = [16, 32], strides = [1, 1]} : vector<16x128xbf16> to vector<16x32xbf16>
    %41 = vector.extract_strided_slice %19 {offsets = [0, 32], sizes = [16, 32], strides = [1, 1]} : vector<16x128xbf16> to vector<16x32xbf16>
    %42 = tpu.transpose %40, [1, 0] : vector<16x32xbf16> -> vector<32x16xbf16>
    %cst_17 = arith.constant dense<0.000000e+00> : vector<16x16xf32>
    %43 = tpu.matmul %39, %42, %cst_17 {dimension_numbers = #tpu.dot_dimension_numbers<[1], [0], [0], [1], [0, 0, 1, 1], [], []>} : vector<16x32xbf16>, vector<32x16xbf16>, vector<16x16xf32> -> vector<16x16xf32>
    %44 = vector.broadcast %3 : vector<1x16xf32> to vector<16x16xf32>
    %45 = arith.addf %43, %44 : vector<16x16xf32>
    %cst_18 = arith.constant dense<0xFF800000> : vector<16xf32>
    %46 = vector.multi_reduction <maximumf>, %45, %cst_18 [1] : vector<16x16xf32> to vector<16xf32>
    %47 = vector.shape_cast %46 : vector<16xf32> to vector<16x1xf32>
    %48 = vector.broadcast %47 : vector<16x1xf32> to vector<16x16xf32>
    %49 = arith.subf %45, %48 : vector<16x16xf32>
    %50 = math.exp %49 : vector<16x16xf32>
    %cst_19 = arith.constant dense<0.000000e+00> : vector<16xf32>
    %51 = vector.multi_reduction <add>, %50, %cst_19 [1] : vector<16x16xf32> to vector<16xf32>
    %52 = vector.shape_cast %51 : vector<16xf32> to vector<16x1xf32>
    %53 = tpu.reciprocal %52 {approx = true} : vector<16x1xf32> -> vector<16x1xf32>
    %54 = vector.broadcast %53 : vector<16x1xf32> to vector<16x16xf32>
    %55 = arith.mulf %50, %54 : vector<16x16xf32>
    %56 = arith.truncf %55 : vector<16x16xf32> to vector<16x16xbf16>
    %cst_20 = arith.constant dense<0.000000e+00> : vector<16x32xf32>
    %57 = tpu.matmul %56, %41, %cst_20 {dimension_numbers = #tpu.dot_dimension_numbers<[1], [0], [0], [1], [0, 0, 1, 1], [], []>} : vector<16x16xbf16>, vector<16x32xbf16>, vector<16x32xf32> -> vector<16x32xf32>
    %58 = vector.extract_strided_slice %15 {offsets = [0, 64], sizes = [16, 32], strides = [1, 1]} : vector<16x128xbf16> to vector<16x32xbf16>
    %59 = vector.extract_strided_slice %17 {offsets = [0, 64], sizes = [16, 32], strides = [1, 1]} : vector<16x128xbf16> to vector<16x32xbf16>
    %60 = vector.extract_strided_slice %19 {offsets = [0, 64], sizes = [16, 32], strides = [1, 1]} : vector<16x128xbf16> to vector<16x32xbf16>
    %61 = tpu.transpose %59, [1, 0] : vector<16x32xbf16> -> vector<32x16xbf16>
    %cst_21 = arith.constant dense<0.000000e+00> : vector<16x16xf32>
    %62 = tpu.matmul %58, %61, %cst_21 {dimension_numbers = #tpu.dot_dimension_numbers<[1], [0], [0], [1], [0, 0, 1, 1], [], []>} : vector<16x32xbf16>, vector<32x16xbf16>, vector<16x16xf32> -> vector<16x16xf32>
    %63 = vector.broadcast %3 : vector<1x16xf32> to vector<16x16xf32>
    %64 = arith.addf %62, %63 : vector<16x16xf32>
    %cst_22 = arith.constant dense<0xFF800000> : vector<16xf32>
    %65 = vector.multi_reduction <maximumf>, %64, %cst_22 [1] : vector<16x16xf32> to vector<16xf32>
    %66 = vector.shape_cast %65 : vector<16xf32> to vector<16x1xf32>
    %67 = vector.broadcast %66 : vector<16x1xf32> to vector<16x16xf32>
    %68 = arith.subf %64, %67 : vector<16x16xf32>
    %69 = math.exp %68 : vector<16x16xf32>
    %cst_23 = arith.constant dense<0.000000e+00> : vector<16xf32>
    %70 = vector.multi_reduction <add>, %69, %cst_23 [1] : vector<16x16xf32> to vector<16xf32>
    %71 = vector.shape_cast %70 : vector<16xf32> to vector<16x1xf32>
    %72 = tpu.reciprocal %71 {approx = true} : vector<16x1xf32> -> vector<16x1xf32>
    %73 = vector.broadcast %72 : vector<16x1xf32> to vector<16x16xf32>
    %74 = arith.mulf %69, %73 : vector<16x16xf32>
    %75 = arith.truncf %74 : vector<16x16xf32> to vector<16x16xbf16>
    %cst_24 = arith.constant dense<0.000000e+00> : vector<16x32xf32>
    %76 = tpu.matmul %75, %60, %cst_24 {dimension_numbers = #tpu.dot_dimension_numbers<[1], [0], [0], [1], [0, 0, 1, 1], [], []>} : vector<16x16xbf16>, vector<16x32xbf16>, vector<16x32xf32> -> vector<16x32xf32>
    %77 = vector.extract_strided_slice %15 {offsets = [0, 96], sizes = [16, 32], strides = [1, 1]} : vector<16x128xbf16> to vector<16x32xbf16>
    %78 = vector.extract_strided_slice %17 {offsets = [0, 96], sizes = [16, 32], strides = [1, 1]} : vector<16x128xbf16> to vector<16x32xbf16>
    %79 = vector.extract_strided_slice %19 {offsets = [0, 96], sizes = [16, 32], strides = [1, 1]} : vector<16x128xbf16> to vector<16x32xbf16>
    %80 = tpu.transpose %78, [1, 0] : vector<16x32xbf16> -> vector<32x16xbf16>
    %cst_25 = arith.constant dense<0.000000e+00> : vector<16x16xf32>
    %81 = tpu.matmul %77, %80, %cst_25 {dimension_numbers = #tpu.dot_dimension_numbers<[1], [0], [0], [1], [0, 0, 1, 1], [], []>} : vector<16x32xbf16>, vector<32x16xbf16>, vector<16x16xf32> -> vector<16x16xf32>
    %82 = vector.broadcast %3 : vector<1x16xf32> to vector<16x16xf32>
    %83 = arith.addf %81, %82 : vector<16x16xf32>
    %cst_26 = arith.constant dense<0xFF800000> : vector<16xf32>
    %84 = vector.multi_reduction <maximumf>, %83, %cst_26 [1] : vector<16x16xf32> to vector<16xf32>
    %85 = vector.shape_cast %84 : vector<16xf32> to vector<16x1xf32>
    %86 = vector.broadcast %85 : vector<16x1xf32> to vector<16x16xf32>
    %87 = arith.subf %83, %86 : vector<16x16xf32>
    %88 = math.exp %87 : vector<16x16xf32>
    %cst_27 = arith.constant dense<0.000000e+00> : vector<16xf32>
    %89 = vector.multi_reduction <add>, %88, %cst_27 [1] : vector<16x16xf32> to vector<16xf32>
    %90 = vector.shape_cast %89 : vector<16xf32> to vector<16x1xf32>
    %91 = tpu.reciprocal %90 {approx = true} : vector<16x1xf32> -> vector<16x1xf32>
    %92 = vector.broadcast %91 : vector<16x1xf32> to vector<16x16xf32>
    %93 = arith.mulf %88, %92 : vector<16x16xf32>
    %94 = arith.truncf %93 : vector<16x16xf32> to vector<16x16xbf16>
    %cst_28 = arith.constant dense<0.000000e+00> : vector<16x32xf32>
    %95 = tpu.matmul %94, %79, %cst_28 {dimension_numbers = #tpu.dot_dimension_numbers<[1], [0], [0], [1], [0, 0, 1, 1], [], []>} : vector<16x16xbf16>, vector<16x32xbf16>, vector<16x32xf32> -> vector<16x32xf32>
    %96 = tpu.concatenate %38, %57, %76, %95 in 1 : vector<16x32xf32>, vector<16x32xf32>, vector<16x32xf32>, vector<16x32xf32> -> vector<16x128xf32>
    %97 = arith.truncf %96 : vector<16x128xf32> to vector<16x128xbf16>
    %c0_29 = arith.constant 0 : index
    %c0_30 = arith.constant 0 : index
    %98 = vector.load %arg5[%c0_29, %c0_30] : memref<128x128xbf16, #tpu.memory_space<vmem>>, vector<128x128xbf16>
    %cst_31 = arith.constant dense<0.000000e+00> : vector<16x128xf32>
    %99 = tpu.matmul %97, %98, %cst_31 {dimension_numbers = #tpu.dot_dimension_numbers<[1], [0], [0], [1], [0, 0, 1, 1], [], []>} : vector<16x128xbf16>, vector<128x128xbf16>, vector<16x128xf32> -> vector<16x128xf32>
    %c1 = arith.constant 1 : index
    %c0_32 = arith.constant 0 : index
    %100 = vector.load %arg8[%c1, %c0_32] : memref<8x384xf32, #tpu.memory_space<vmem>>, vector<1x128xf32>
    %101 = vector.broadcast %100 : vector<1x128xf32> to vector<16x128xf32>
    %102 = arith.addf %99, %101 : vector<16x128xf32>
    %103 = arith.addf %102, %1 : vector<16x128xf32>
    %cst_33 = arith.constant dense<0.000000e+00> : vector<16xf32>
    %104 = vector.multi_reduction <add>, %103, %cst_33 [1] : vector<16x128xf32> to vector<16xf32>
    %105 = vector.shape_cast %104 : vector<16xf32> to vector<16x1xf32>
    %cst_34 = arith.constant 1.280000e+02 : f32
    %106 = vector.broadcast %cst_34 : f32 to vector<16x1xf32>
    %107 = arith.divf %105, %106 : vector<16x1xf32>
    %108 = vector.broadcast %107 : vector<16x1xf32> to vector<16x128xf32>
    %109 = arith.subf %103, %108 : vector<16x128xf32>
    %110 = arith.mulf %109, %109 : vector<16x128xf32>
    %cst_35 = arith.constant dense<0.000000e+00> : vector<16xf32>
    %111 = vector.multi_reduction <add>, %110, %cst_35 [1] : vector<16x128xf32> to vector<16xf32>
    %112 = vector.shape_cast %111 : vector<16xf32> to vector<16x1xf32>
    %cst_36 = arith.constant 1.280000e+02 : f32
    %113 = vector.broadcast %cst_36 : f32 to vector<16x1xf32>
    %114 = arith.divf %112, %113 : vector<16x1xf32>
    %115 = vector.broadcast %107 : vector<16x1xf32> to vector<16x128xf32>
    %116 = arith.subf %103, %115 : vector<16x128xf32>
    %cst_37 = arith.constant 9.99999974E-6 : f32
    %117 = vector.broadcast %cst_37 : f32 to vector<16x1xf32>
    %118 = arith.addf %114, %117 : vector<16x1xf32>
    %119 = math.rsqrt %118 : vector<16x1xf32>
    %120 = vector.broadcast %119 : vector<16x1xf32> to vector<16x128xf32>
    %121 = arith.mulf %116, %120 : vector<16x128xf32>
    %c2 = arith.constant 2 : index
    %c0_38 = arith.constant 0 : index
    %122 = vector.load %arg8[%c2, %c0_38] : memref<8x384xf32, #tpu.memory_space<vmem>>, vector<1x128xf32>
    %123 = vector.broadcast %122 : vector<1x128xf32> to vector<16x128xf32>
    %124 = arith.mulf %121, %123 : vector<16x128xf32>
    %c3 = arith.constant 3 : index
    %c0_39 = arith.constant 0 : index
    %125 = vector.load %arg8[%c3, %c0_39] : memref<8x384xf32, #tpu.memory_space<vmem>>, vector<1x128xf32>
    %126 = vector.broadcast %125 : vector<1x128xf32> to vector<16x128xf32>
    %127 = arith.addf %124, %126 : vector<16x128xf32>
    %128 = vector.broadcast %5 : vector<16x1xf32> to vector<16x128xf32>
    %129 = arith.mulf %127, %128 : vector<16x128xf32>
    %130 = arith.truncf %129 : vector<16x128xf32> to vector<16x128xbf16>
    %c0_40 = arith.constant 0 : index
    %c0_41 = arith.constant 0 : index
    %131 = vector.load %arg6[%c0_40, %c0_41] : memref<128x256xbf16, #tpu.memory_space<vmem>>, vector<128x256xbf16>
    %cst_42 = arith.constant dense<0.000000e+00> : vector<16x256xf32>
    %132 = tpu.matmul %130, %131, %cst_42 {dimension_numbers = #tpu.dot_dimension_numbers<[1], [0], [0], [1], [0, 0, 1, 1], [], []>} : vector<16x128xbf16>, vector<128x256xbf16>, vector<16x256xf32> -> vector<16x256xf32>
    %c4 = arith.constant 4 : index
    %c0_43 = arith.constant 0 : index
    %133 = vector.load %arg8[%c4, %c0_43] : memref<8x384xf32, #tpu.memory_space<vmem>>, vector<1x256xf32>
    %134 = vector.broadcast %133 : vector<1x256xf32> to vector<16x256xf32>
    %135 = arith.addf %132, %134 : vector<16x256xf32>
    %cst_44 = arith.constant 0.000000e+00 : f32
    %136 = vector.broadcast %cst_44 : f32 to vector<16x256xf32>
    %137 = arith.maximumf %135, %136 : vector<16x256xf32>
    %138 = arith.truncf %137 : vector<16x256xf32> to vector<16x256xbf16>
    %c0_45 = arith.constant 0 : index
    %c0_46 = arith.constant 0 : index
    %139 = vector.load %arg7[%c0_45, %c0_46] : memref<256x128xbf16, #tpu.memory_space<vmem>>, vector<256x128xbf16>
    %cst_47 = arith.constant dense<0.000000e+00> : vector<16x128xf32>
    %140 = tpu.matmul %138, %139, %cst_47 {dimension_numbers = #tpu.dot_dimension_numbers<[1], [0], [0], [1], [0, 0, 1, 1], [], []>} : vector<16x256xbf16>, vector<256x128xbf16>, vector<16x128xf32> -> vector<16x128xf32>
    %c5 = arith.constant 5 : index
    %c0_48 = arith.constant 0 : index
    %141 = vector.load %arg8[%c5, %c0_48] : memref<8x384xf32, #tpu.memory_space<vmem>>, vector<1x128xf32>
    %142 = vector.broadcast %141 : vector<1x128xf32> to vector<16x128xf32>
    %143 = arith.addf %140, %142 : vector<16x128xf32>
    %144 = arith.addf %143, %129 : vector<16x128xf32>
    %cst_49 = arith.constant dense<0.000000e+00> : vector<16xf32>
    %145 = vector.multi_reduction <add>, %144, %cst_49 [1] : vector<16x128xf32> to vector<16xf32>
    %146 = vector.shape_cast %145 : vector<16xf32> to vector<16x1xf32>
    %cst_50 = arith.constant 1.280000e+02 : f32
    %147 = vector.broadcast %cst_50 : f32 to vector<16x1xf32>
    %148 = arith.divf %146, %147 : vector<16x1xf32>
    %149 = vector.broadcast %148 : vector<16x1xf32> to vector<16x128xf32>
    %150 = arith.subf %144, %149 : vector<16x128xf32>
    %151 = arith.mulf %150, %150 : vector<16x128xf32>
    %cst_51 = arith.constant dense<0.000000e+00> : vector<16xf32>
    %152 = vector.multi_reduction <add>, %151, %cst_51 [1] : vector<16x128xf32> to vector<16xf32>
    %153 = vector.shape_cast %152 : vector<16xf32> to vector<16x1xf32>
    %cst_52 = arith.constant 1.280000e+02 : f32
    %154 = vector.broadcast %cst_52 : f32 to vector<16x1xf32>
    %155 = arith.divf %153, %154 : vector<16x1xf32>
    %156 = vector.broadcast %148 : vector<16x1xf32> to vector<16x128xf32>
    %157 = arith.subf %144, %156 : vector<16x128xf32>
    %cst_53 = arith.constant 9.99999974E-6 : f32
    %158 = vector.broadcast %cst_53 : f32 to vector<16x1xf32>
    %159 = arith.addf %155, %158 : vector<16x1xf32>
    %160 = math.rsqrt %159 : vector<16x1xf32>
    %161 = vector.broadcast %160 : vector<16x1xf32> to vector<16x128xf32>
    %162 = arith.mulf %157, %161 : vector<16x128xf32>
    %c6 = arith.constant 6 : index
    %c0_54 = arith.constant 0 : index
    %163 = vector.load %arg8[%c6, %c0_54] : memref<8x384xf32, #tpu.memory_space<vmem>>, vector<1x128xf32>
    %164 = vector.broadcast %163 : vector<1x128xf32> to vector<16x128xf32>
    %165 = arith.mulf %162, %164 : vector<16x128xf32>
    %c7 = arith.constant 7 : index
    %c0_55 = arith.constant 0 : index
    %166 = vector.load %arg8[%c7, %c0_55] : memref<8x384xf32, #tpu.memory_space<vmem>>, vector<1x128xf32>
    %167 = vector.broadcast %166 : vector<1x128xf32> to vector<16x128xf32>
    %168 = arith.addf %165, %167 : vector<16x128xf32>
    %169 = vector.broadcast %5 : vector<16x1xf32> to vector<16x128xf32>
    %170 = arith.mulf %168, %169 : vector<16x128xf32>
    %c0_56 = arith.constant 0 : index
    %c0_57 = arith.constant 0 : index
    %c0_58 = arith.constant 0 : index
    %171 = vector.load %arg9[%c0_56, %c0_57, %c0_58] : memref<1x16x128xf32, #tpu.memory_space<vmem>>, vector<1x16x128xf32>
    %172 = vector.shape_cast %171 : vector<1x16x128xf32> to vector<16x128xf32>
    %173 = vector.shape_cast %170 : vector<16x128xf32> to vector<1x16x128xf32>
    tpu.vector_store %arg9[%c0_56, %c0_57, %c0_58], %173 {strides = array<i32>} : memref<1x16x128xf32, #tpu.memory_space<vmem>>, vector<1x16x128xf32>,
    return
  }
  func.func @transform_0(%arg0: i32) -> (i32, i32, i32) {
    %c0_i32 = arith.constant 0 : i32
    %c0_i32_0 = arith.constant 0 : i32
    %c0_i32_1 = arith.constant 0 : i32
    return %arg0, %c0_i32, %c0_i32_0 : i32, i32, i32
  }
  func.func @transform_1(%arg0: i32) -> (i32, i32, i32) {
    %c0_i32 = arith.constant 0 : i32
    %c0_i32_0 = arith.constant 0 : i32
    %c0_i32_1 = arith.constant 0 : i32
    return %arg0, %c0_i32, %c0_i32_0 : i32, i32, i32
  }
  func.func @transform_2(%arg0: i32) -> (i32, i32, i32) {
    %c0_i32 = arith.constant 0 : i32
    %c0_i32_0 = arith.constant 0 : i32
    %c0_i32_1 = arith.constant 0 : i32
    return %arg0, %c0_i32, %c0_i32_0 : i32, i32, i32
  }
  func.func @transform_3(%arg0: i32) -> (i32, i32) {
    %c0_i32 = arith.constant 0 : i32
    %c0_i32_0 = arith.constant 0 : i32
    %c0_i32_1 = arith.constant 0 : i32
    return %c0_i32, %c0_i32_0 : i32, i32
  }
  func.func @transform_4(%arg0: i32) -> (i32, i32) {
    %c0_i32 = arith.constant 0 : i32
    %c0_i32_0 = arith.constant 0 : i32
    %c0_i32_1 = arith.constant 0 : i32
    return %c0_i32, %c0_i32_0 : i32, i32
  }
  func.func @transform_5(%arg0: i32) -> (i32, i32) {
    %c0_i32 = arith.constant 0 : i32
    %c0_i32_0 = arith.constant 0 : i32
    %c0_i32_1 = arith.constant 0 : i32
    return %c0_i32, %c0_i32_0 : i32, i32
  }
  func.func @transform_6(%arg0: i32) -> (i32, i32) {
    %c0_i32 = arith.constant 0 : i32
    %c0_i32_0 = arith.constant 0 : i32
    %c0_i32_1 = arith.constant 0 : i32
    return %c0_i32, %c0_i32_0 : i32, i32
  }
  func.func @transform_7(%arg0: i32) -> (i32, i32) {
    %c0_i32 = arith.constant 0 : i32
    %c0_i32_0 = arith.constant 0 : i32
    %c0_i32_1 = arith.constant 0 : i32
    return %c0_i32, %c0_i32_0 : i32, i32
  }
  func.func @transform_8(%arg0: i32) -> (i32, i32, i32) {
    %c0_i32 = arith.constant 0 : i32
    %c0_i32_0 = arith.constant 0 : i32
    %c0_i32_1 = arith.constant 0 : i32
    return %arg0, %c0_i32, %c0_i32_0 : i32, i32, i32
  }
}

</mosaic_0001>

<bundles_post_ra>
// kernel: tpu_custom_call.1
= control target key start
LH: loop header
LB: loop body
LE: loop exit
PB: predicated region body
PF: predicated region fallthrough
CT: control target
= control target key end

     0   :  { %13 = vsyncpa [#allocation3], 0  ;;  %s3104_s0 = inlined_call_operand.vmem [shape: f32[2,16,128], index: 0, kind: input, shape index: {}]   ;;  %s3105_s1 = inlined_call_operand.hbm [shape: f32[2,1,16], index: 1, kind: input, shape index: {}]   ;;  %s3106_s2 = inlined_call_operand.vmem [shape: f32[2,16,1], index: 2, kind: input, shape index: {}]   ;;  %s3107_s3 = inlined_call_operand.hbm [shape: bf16[128,384], index: 3, kind: input, shape index: {}]   ;;  %s3108_s4 = inlined_call_operand.hbm [shape: bf16[128,128], index: 4, kind: input, shape index: {}]   ;;  %s3109_s5 = inlined_call_operand.hbm [shape: bf16[128,256], index: 5, kind: input, shape index: {}]   ;;  %s3110_s6 = inlined_call_operand.hbm [shape: bf16[256,128], index: 6, kind: input, shape index: {}]   ;;  %s3111_s7 = inlined_call_operand.vmem [shape: f32[8,384], index: 7, kind: input, shape index: {}]   ;;  %s3112_s8 = inlined_call_operand.hbm [shape: f32[2,16,128], index: 8, kind: output, shape index: {}]  }
   0x1   :  { %15 = vsyncpa [#allocation3 + $0x1], 0 }
   0x2   :  { %16 = vsyncpa [#allocation6], 0 }
   0x3   :  { %17 = vsyncpa [#allocation9], 0 }
   0x4   :  { %18 = vsyncpa [#allocation4], 0 }
   0x5   :  { %20 = vsyncpa [#allocation4 + $0x1], 0  ;;  %s2633_s27 = smov 0   ;;  %s2635_s28 = smov 0  }
   0x6   :  { %s2637_s29 = smov 0   ;;  %s2639_s30 = smov 0  }
   0x7 LB: > { %s2568_s9 = smov [#allocation5]   ;;  %s2654_s11 = sadd.s32 4294967295, %s2566_s30   ;;  %s2566_s30 = sphi %s2639_s30, %s3136_s30   ;;  %s2562_s29 = sphi %s2637_s29, %s3135_s29   ;;  %s2558_s28 = sphi %s2635_s28, %s3134_s28   ;;  %s2554_s27 = sphi %s2633_s27, %s3133_s27  }
   0x8   : > { %s252_s10 = sshll.u32 %s2568_s9, 4  ;;  %p1869_p0 = scmp.ge.s32.totalorder %s2566_s30, 1  ;;  %s2659_s10 = int_to_ptr.vmem [resolvable:$true] %s252_s10 }
   0x9   : > { %p3113_p1 = scmp.eq.s32.totalorder %s2654_s11, 0  ;;  %p240_p2 = scmp.lt.s32.totalorder %s2566_s30, 3 }
   0xa   : > { %s2569_s13 = smov [#allocation8]   ;;  %s2570_s16 = smov [#allocation7]  }
   0xb   : > { %p2661_p3 = pnand %p1869_p0, %p240_p2  ;;  %s278_s14 = sshll.u32 %s2569_s13, 4  ;;  %s2674_s14 = int_to_ptr.vmem [resolvable:$true] %s278_s14 }
   0xc   : > { %s2676_s17 = sshll.u32 %s2570_s16, 4  ;;  %s2350_s20 = scalar_lea.hbm %s3107_s3, 3072  ;;  %s266_s17 = int_to_ptr.vmem [resolvable:$true] %s2676_s17 }
   0xd   : > { %s3116_s12 = scalar_select %p2661_p3, 1, 0 }
   0xe   : > { %p2132_p5 = pneg %p2661_p3  ;;  %p2351_p7 = scmp.ne.s32.totalorder %s3107_s3, %s2350_s20 }
   0xf   : > { %p2357_p11 = scmp.lt.u32.totalorder %s2350_s20, %s3107_s3 }
  0x10   : > { %p2670_p6 = pnand %p2132_p5, %p3113_p1 }
  0x12   : > { %p2686_p8 = pneg %p2670_p6 }
  0x14   : > { %p2353_p9 = pnand %p2686_p8, %p2351_p7 }
  0x16   : > { %p2354_p10 = pneg %p2353_p9 }
  0x18   : > { %p2359_p12 = pnand %p2357_p11, %p2354_p10 }
  0x1a   : > { %2362 = shalt.err (!%p2359_p12)
}
  0x1b   : > { %s2363_s26 = scalar_lea.vmem %s2659_s10, 3072  ;;  %p2371_p5 = scmp.lt.s32.totalorder %s2659_s10, %s2659_s10 }
  0x1c   : > { %p2364_p13 = scmp.ne.s32.totalorder %s2659_s10, %s2363_s26  ;;  %p2372_p4 = scmp.lt.s32.totalorder %s2363_s26, %s2363_s26 }
  0x1e   : > { %p2366_p0 = pnand %p2364_p13, %p2686_p8  ;;  %p2373_p7 = por %p2372_p4, %p2371_p5 }
  0x20   : > { %p2367_p2 = pneg %p2366_p0 }
  0x22   : > { %p2374_p9 = pnand %p2373_p7, %p2367_p2 }
  0x24   : > { %2377 = shalt.err (!%p2374_p9)
}
  0x25   : > { %s2571_s9 = smov 192   ;;  %s2572_s13 = smov 12  }
  0x26   : > { %2135 = dma.hbm_to_vmem [thread:$0]  (!%p2670_p6), %s3107_s3, 3072, %s2659_s10, [#allocation6], %s2571_s9, %s2571_s9, %s2572_s13  }
  0x27   : > { %s2378_s21 = scalar_lea.hbm %s3109_s5, 2048 }
  0x28   : > { %p2379_p4 = scmp.ne.s32.totalorder %s3109_s5, %s2378_s21  ;;  %p2385_p12 = scmp.lt.u32.totalorder %s2378_s21, %s3109_s5 }
  0x2a   : > { %p2381_p10 = pnand %p2379_p4, %p2686_p8 }
  0x2c   : > { %p2382_p11 = pneg %p2381_p10 }
  0x2e   : > { %p2387_p13 = pnand %p2385_p12, %p2382_p11 }
  0x30   : > { %2390 = shalt.err (!%p2387_p13)
}
  0x31   : > { %s2391_s10 = scalar_lea.vmem %s2674_s14, 2048  ;;  %p2399_p7 = scmp.lt.s32.totalorder %s2674_s14, %s2674_s14 }
  0x32   : > { %p2392_p0 = scmp.ne.s32.totalorder %s2674_s14, %s2391_s10  ;;  %p2400_p9 = scmp.lt.s32.totalorder %s2391_s10, %s2391_s10 }
  0x34   : > { %p2394_p2 = pnand %p2392_p0, %p2686_p8  ;;  %p2401_p4 = por %p2400_p9, %p2399_p7 }
  0x36   : > { %p2395_p5 = pneg %p2394_p2 }
  0x38   : > { %p2402_p10 = pnand %p2401_p4, %p2395_p5 }
  0x3a   : > { %2405 = shalt.err (!%p2402_p10)
}
  0x3b   : > { %s2573_s9 = smov 128   ;;  %s2574_s13 = smov 8  }
  0x3c   : > { %2141 = dma.hbm_to_vmem [thread:$0]  (!%p2670_p6), %s3109_s5, 2048, %s2674_s14, [#allocation9], %s2573_s9, %s2573_s9, %s2574_s13  }
  0x3d   : > { %s2406_s21 = scalar_lea.hbm %s3108_s4, 1024 }
  0x3e   : > { %p2407_p11 = scmp.ne.s32.totalorder %s3108_s4, %s2406_s21  ;;  %p2413_p0 = scmp.lt.u32.totalorder %s2406_s21, %s3108_s4 }
  0x40   : > { %p2409_p12 = pnand %p2407_p11, %p2686_p8 }
  0x42   : > { %p2410_p13 = pneg %p2409_p12 }
  0x44   : > { %p2415_p2 = pnand %p2413_p0, %p2410_p13 }
  0x46   : > { %2418 = shalt.err (!%p2415_p2)
}
  0x47   : > { %s2419_s10 = scalar_lea.vmem %s266_s17, 1024  ;;  %p2427_p4 = scmp.lt.s32.totalorder %s266_s17, %s266_s17 }
  0x48   : > { %p2420_p5 = scmp.ne.s32.totalorder %s266_s17, %s2419_s10  ;;  %p2428_p10 = scmp.lt.s32.totalorder %s2419_s10, %s2419_s10 }
  0x4a   : > { %p2422_p7 = pnand %p2420_p5, %p2686_p8  ;;  %p2429_p1 = por %p2428_p10, %p2427_p4 }
  0x4c   : > { %p2423_p9 = pneg %p2422_p7 }
  0x4e   : > { %p2430_p3 = pnand %p2429_p1, %p2423_p9 }
  0x50   : > { %2433 = shalt.err (!%p2430_p3)
}
  0x51   : > { %s2575_s14 = smov 64   ;;  %s2576_s9 = smov 4  }
  0x52   : > { %2138 = dma.hbm_to_vmem [thread:$0]  (!%p2670_p6), %s3108_s4, 1024, %s266_s17, [#allocation6], %s2575_s14, %s2575_s14, %s2576_s9  }
  0x53   : > { %s2577_s18 = smov [#allocation10]   ;;  %s2434_s22 = scalar_lea.hbm %s3110_s6, 2048 }
  0x54   : > { %s291_s19 = sshll.u32 %s2577_s18, 4  ;;  %p2435_p1 = scmp.ne.s32.totalorder %s3110_s6, %s2434_s22  ;;  %s292_s19 = int_to_ptr.vmem [resolvable:$true] %s291_s19 }
  0x55   : > { %p2441_p12 = scmp.lt.u32.totalorder %s2434_s22, %s3110_s6 }
  0x56   : > { %p2437_p3 = pnand %p2435_p1, %p2686_p8 }
  0x58   : > { %p2438_p11 = pneg %p2437_p3 }
  0x5a   : > { %p2443_p13 = pnand %p2441_p12, %p2438_p11 }
  0x5c   : > { %2446 = shalt.err (!%p2443_p13)
}
  0x5d   : > { %s2447_s17 = scalar_lea.vmem %s292_s19, 2048  ;;  %p2455_p7 = scmp.lt.s32.totalorder %s292_s19, %s292_s19 }
  0x5e   : > { %p2448_p0 = scmp.ne.s32.totalorder %s292_s19, %s2447_s17  ;;  %p2456_p9 = scmp.lt.s32.totalorder %s2447_s17, %s2447_s17 }
  0x60   : > { %p2450_p2 = pnand %p2448_p0, %p2686_p8  ;;  %p2457_p4 = por %p2456_p9, %p2455_p7 }
  0x62   : > { %p2451_p5 = pneg %p2450_p2 }
  0x64   : > { %p2458_p10 = pnand %p2457_p4, %p2451_p5 }
  0x66   : > { %2461 = shalt.err (!%p2458_p10)
}
  0x67   : > { %2144 = dma.hbm_to_vmem [thread:$0]  (!%p2670_p6), %s3110_s6, 2048, %s292_s19, [#allocation9], %s2575_s14, %s2575_s14, %s2576_s9  }
  0x68   : > { %s1868_s23 = sadd.s32 4294967294, %s2566_s30   ;;  %s2769_s15 = sadd.s32 1, %s2566_s30  }
  0x69   : > { %s56_s18 = ssub.s32 %s2566_s30, %s2769_s15  ;;  %s59_s20 = sadd.s32 1, %s2562_s29 }
  0x6a   : > { %p57_p8 = scmp.eq.s32.totalorder %s56_s18, 0  ;;  %p66_p1 = scmp.ne.s32.totalorder %s2562_s29, %s2558_s28 }
  0x6b   : > { %p67_p3 = scmp.eq.s32.totalorder %s2566_s30, 0  ;;  %p72_p11 = scmp.ne.s32.totalorder %s2558_s28, %s2554_s27 }
  0x6c   : > { %s2780_s21 = scalar_select %p57_p8, %s2562_s29, %s59_s20  }
  0x6d   : > { %p2782_p12 = por %p67_p3, %p66_p1  ;;  %p3120_p13 = scmp.eq.s32.totalorder %s2654_s11, 0 }
  0x6e   : > { %p227_p0 = scmp.eq.s32.totalorder %s2654_s11, 1  ;;  %p233_p2 = scmp.eq.s32.totalorder %s1868_s23, 1 }
  0x6f   : > { %p2788_p6 = por %p3120_p13, %p72_p11  ;;  %p2157_p5 = scmp.lt.s32.totalorder %s2566_s30, 2 }
  0x70   : > { %s316_s9 = sand.u32 1, %s2562_s29   ;;  %p2795_p7 = por %p227_p0, %p66_p1 }
  0x71   : > { %p2799_p9 = por %p233_p2, %p72_p11  ;;  %s1875_s25 = sshll.u32 %s2566_s30, 4 }
  0x72   : > { %s3122_s19 = scalar_select %p2795_p7, 1, 0 }
  0x73   : > { %s3123_s24 = scalar_select %p2799_p9, 1, 0 }
  0x74   : > { %s319_s26 = scalar_lea.vmem [#allocation2], %s316_s9  ;;  %s2807_s16 = scalar_lea.hbm %s3105_s1, %s1875_s25 }
  0x75   : > { %s326_s10 = sshll.u32 %s319_s26, 4  ;;  %p2813_p4 = pnand %p2157_p5, %p2782_p12  ;;  %s2809_s10 = int_to_ptr.vmem [resolvable:$true] %s326_s10 }
  0x76   : > { %s317_s18 = scalar_lea.sflag [#allocation3], %s316_s9  ;;  %s2462_s20 = scalar_lea.hbm %s2807_s16, 16 }
  0x77   : > { %p2463_p10 = scmp.ne.s32.totalorder %s2807_s16, %s2462_s20  ;;  %p2464_p8 = pneg %p2813_p4 }
  0x78   : > { %s2467_s17 = scalar_lea.hbm %s3105_s1, 32  ;;  %p2468_p11 = scmp.lt.u32.totalorder %s2807_s16, %s3105_s1 }
  0x79   : > { %p2465_p1 = pnand %p2464_p8, %p2463_p10  ;;  %p2469_p12 = scmp.lt.u32.totalorder %s2467_s17, %s2462_s20 }
  0x7a   : > { %p2471_p0 = scmp.lt.u32.totalorder %s2462_s20, %s2807_s16 }
  0x7b   : > { %p2466_p3 = pneg %p2465_p1  ;;  %p2470_p13 = por %p2469_p12, %p2468_p11 }
  0x7d   : > { %p2472_p2 = por %p2471_p0, %p2470_p13 }
  0x7f   : > { %p2473_p5 = pnand %p2472_p2, %p2466_p3 }
  0x81   : > { %2476 = shalt.err (!%p2473_p5)
}
  0x82   : > { %s2477_s9 = scalar_lea.vmem %s2809_s10, 16  ;;  %s2578_s25 = smov [#allocation2]  }
  0x83   : > { %p2478_p10 = scmp.ne.s32.totalorder %s2809_s10, %s2477_s9  ;;  %s2482_s26 = sshll.u32 %s2578_s25, 4  ;;  %s2483_s26 = int_to_ptr.vmem [resolvable:$false] %s2482_s26 }
  0x84   : > { %s2484_s22 = scalar_lea.vmem %s2483_s26, 32  ;;  %p2485_p7 = scmp.lt.s32.totalorder %s2809_s10, %s2483_s26 }
  0x85   : > { %p2480_p1 = pnand %p2478_p10, %p2464_p8  ;;  %p2486_p11 = scmp.lt.s32.totalorder %s2484_s22, %s2477_s9 }
  0x87   : > { %p2481_p9 = pneg %p2480_p1  ;;  %p2487_p12 = por %p2486_p11, %p2485_p7 }
  0x89   : > { %p2488_p13 = pnand %p2487_p12, %p2481_p9 }
  0x8b   : > { %2491 = shalt.err (!%p2488_p13)
}
  0x8c   : > { %2148 = dma.hbm_to_vmem [thread:$0]  (!%p2813_p4), %s2807_s16, 16, %s2809_s10, %s317_s18  }
  0x8d   : > { %p3125_p3 = scmp.ne.s32.totalorder %s3116_s12, 0 }
  0x8e   : > { %s2845_s20 = sand.u32 (!%p3125_p3), 1, %s2558_s28  }
  0x8f   : > { %343 = sbr.rel (%p3125_p3) target bundleno = 3168 (0xc60), region = 52  ;;  %s346_s17 = scalar_lea.sflag (!%p3125_p3), [#allocation3], %s2845_s20 }
  0x90   : > { %s348_s13 = scalar_lea.vmem (!%p3125_p3), [#allocation2], %s2845_s20 }
  0x96   : > { %2537 = dma.done.wait (%p2788_p6), %s346_s17, 16  }
  0x97   : > { %2539 = vsyncadd (%p2788_p6), %s346_s17, 4294967280  ;;  %p3126_p7 = scmp.eq.s32.totalorder %s2654_s11, 0 }
  0x99   : > { %2541 = dma.done.wait (%p3126_p7), [#allocation6], 4096   ;;  %p3127_p9 = pmov %p3126_p7 }
  0x9a   : > { %p3128_p4 = pmov %p3126_p7 }
  0x9b   : > { %2543 = vsyncadd (%p3127_p9), [#allocation6], 4294963200 }
  0x9c   : > { %2545 = dma.done.wait (%p3128_p4), [#allocation9], 4096   ;;  %p3129_p8 = pmov %p3128_p4 }
  0x9d   : > { %v2579_v0 = vmov 0   ;;  %v2580_v1 = vmov 0.0   ;;  %v2230_v2 = vld [vmem:[#allocation5 + $0x4] ss:$12 sps:$4 sm:$0xff]   ;;  %v2232_v3 = vld [vmem:[#allocation5] ss:$12 sps:$4 sm:$0xff]   ;;  %v457_v29 = vlaneseq }
  0x9e   : > { %2547 = vsyncadd (%p3129_p8), [#allocation9], 4294963200  ;;  %632 = vmatprep.mubr.bf16.mxu0 %v2579_v0  ;;  %2024 = vmatprep.subr.bf16.mxu1 %v2580_v1  ;;  %v2233_v4 = vld [vmem:[#allocation5 + $0x1c] ss:$12 sps:$4 sm:$0xff]   ;;  %v2235_v5 = vld [vmem:[#allocation5 + $0x18] ss:$12 sps:$4 sm:$0xff]  }
  0x9f   : > { %2228 = vset.pattern.permute.xlu0 %v2579_v0  ;;  %2229 = vset.pattern.permute.xlu1 %v2579_v0  ;;  %v2236_v6 = vld [vmem:[#allocation5 + $0x34] ss:$12 sps:$4 sm:$0xff]   ;;  %v2238_v7 = vld [vmem:[#allocation5 + $0x30] ss:$12 sps:$4 sm:$0xff]   ;;  %v2239_v8 = vld [vmem:[#allocation5 + $0x4c] ss:$12 sps:$4 sm:$0xff]  }
  0xa0   : > { %600 = vmatprep.subr.bf16.mxu0 %v2230_v2  ;;  %p406_p6 = scmp.lt.s32.totalorder %s2654_s11, 1  ;;  %v2241_v9 = vld [vmem:[#allocation5 + $0x48] ss:$12 sps:$4 sm:$0xff]   ;;  %v2242_v10 = vld [vmem:[#allocation5 + $0x64] ss:$12 sps:$4 sm:$0xff]   ;;  %vm2581_vm0 = vmmov 0  }
  0xa1   : > { %601 = vmatpush1.bf16.msra.mxu0 %v2232_v3  ;;  %v2254_v11 = vld [vmem:[#allocation5 + $0x8] ss:$12 sps:$4 sm:$0xff]   ;;  %v2255_v12 = vld [vmem:[#allocation5 + $0x20] ss:$12 sps:$4 sm:$0xff]   ;;  %v2247_v15 = vld [vmem:[#allocation5 + $0x78] ss:$12 sps:$4 sm:$0xff]   ;;  %2040 = vmatprep.mubr.msk.bf16.mxu1 %vm2581_vm0, %v2580_v1 }
  0xa2   : > { %602 = vmatprep.subr.bf16.mxu0 %v2233_v4  ;;  %s2867_s12 = scalar_select %p406_p6, %s2654_s11, 1  ;;  %2025 = vmatpush3.bf16.msra.mxu1 %v2254_v11  ;;  %v2244_v13 = vld [vmem:[#allocation5 + $0x60] ss:$12 sps:$4 sm:$0xff]   ;;  %v2245_v14 = vld [vmem:[#allocation5 + $0x7c] ss:$12 sps:$4 sm:$0xff]   ;;  %v2896_v30 = vshrl.u32 %v457_v29, 7 }
  0xa3   : > { %2026 = vmatprep.subr.bf16.mxu1 %v2580_v1  ;;  %v2248_v16 = vld [vmem:[#allocation5 + $0x94] ss:$12 sps:$4 sm:$0xff]   ;;  %v2256_v17 = vld [vmem:[#allocation5 + $0x38] ss:$12 sps:$4 sm:$0xff]   ;;  %v2257_v18 = vld [vmem:[#allocation5 + $0x50] ss:$12 sps:$4 sm:$0xff]  }
  0xa4   : > { %s1965_s14 = sshll.u32 %s2867_s12, 4  ;;  %v2250_v19 = vld [vmem:[#allocation5 + $0x90] ss:$12 sps:$4 sm:$0xff]   ;;  %v2251_v20 = vld [vmem:[#allocation5 + $0xac] ss:$12 sps:$4 sm:$0xff]   ;;  %v459_v31 = vsub.s32 0, %v2896_v30 }
  0xa5   : > { %603 = vmatpush1.bf16.msra.mxu0 %v2235_v5  ;;  %s410_s23 = scalar_lea.vmem %s3104_s0, %s1965_s14  ;;  %v2258_v21 = vld [vmem:[#allocation5 + $0x68] ss:$12 sps:$4 sm:$0xff]   ;;  %v2259_v25 = vld [vmem:[#allocation5 + $0x80] ss:$12 sps:$4 sm:$0xff]   ;;  %v2260_v27 = vld [vmem:[#allocation5 + $0x98] ss:$12 sps:$4 sm:$0xff]  }
  0xa6   : > { %604 = vmatprep.subr.bf16.mxu0 %v2236_v6  ;;  %2027 = vmatpush3.bf16.msra.mxu1 %v2255_v12  ;;  %v2253_v22 = vld [vmem:[#allocation5 + $0xa8] ss:$12 sps:$4 sm:$0xff]   ;;  %v2878_v23 = vld [vmem:[%s410_s23] sm:$0xff]  ;;  %v463_v33 = vsub.s32 1, %v2896_v30  ;;  %vm695_vm1 = vcmask 261120   ;;  %v467_v49 = vsub.s32 2, %v2896_v30 }
  0xa7   : > { %2028 = vmatprep.subr.bf16.mxu1 %v2580_v1  ;;  %v2880_v24 = vld [vmem:[%s410_s23 + $0x8] sm:$0xff]  ;;  %v2261_v28 = vld [vmem:[#allocation5 + $0xb0] ss:$12 sps:$4 sm:$0xff]   ;;  %vm743_vm2 = vcmask 130048   ;;  %s2582_s25 = smov 96   ;;  %s2583_s26 = smov 32  }
  0xa8   : > { %v422_v26 = vpack.c.bf16 %v2880_v24, %v2878_v23  ;;  %v455_v32 = vld [vmem:[%s3111_s7] ss:$8 sm:$0x7]  ;;  %s2584_s22 = smov 64   ;;  %vm1203_vm3 = vcmask 523264   ;;  %vm1206_vm4 = vcmask 785408   ;;  %s415_s23 = scalar_lea.vmem %s3106_s2, %s1965_s14 }
  0xa9   : > { %605 = vmatpush1.bf16.msra.mxu0 %v2238_v7  ;;  %v460_v34 = vrot.slane %v455_v32, %v459_v31  ;;  %v464_v36 = vrot.slane %v455_v32, %v463_v33  ;;  %v468_v50 = vrot.slane %v455_v32, %v467_v49  ;;  %v2919_v58 = vld [vmem:[%s348_s13] ss:$0 sm:$0xff]  ;;  %v1550_v30 = vld [vmem:[%s3111_s7 + $0x5] ss:$0 sm:$0xff]  ;;  %s1881_s12 = sshll.u32 %s2845_s20, 4  ;;  %s1967_s14 = sshll.u32 %s2654_s11, 8 }
  0xaa   : > { %606 = vmatprep.subr.bf16.mxu0 %v2239_v8  ;;  %2029 = vmatpush3.bf16.msra.mxu1 %v2256_v17  ;;  %s405_s18 = scalar_lea.vmem [#allocation11], %s1881_s12  ;;  %s1723_s17 = scalar_lea.sflag [#allocation4], %s2845_s20 }
  0xab   : > { %2030 = vmatprep.subr.bf16.mxu1 %v2580_v1  ;;  %s1736_s9 = sshll.u32 %s405_s18, 4  ;;  %p3130_p2 = scmp.ne.s32.totalorder %s3122_s19, 0  ;;  %s3059_s9 = int_to_ptr.vmem [resolvable:$true] %s1736_s9 }
  0xac   : > { %s2492_s13 = scalar_lea.vmem %s3059_s9, 256  ;;  %s2585_s11 = smov [#allocation11]  }
  0xad   : > { %607 = vmatpush1.bf16.msra.mxu0 %v2241_v9  ;;  %p2493_p0 = scmp.ne.s32.totalorder %s3059_s9, %s2492_s13  ;;  %s2496_s10 = sshll.u32 %s2585_s11, 4  ;;  %s2497_s10 = int_to_ptr.vmem [resolvable:$false] %s2496_s10 }
  0xae   : > { %608 = vmatprep.subr.bf16.mxu0 %v2242_v10  ;;  %2031 = vmatpush3.bf16.msra.mxu1 %v2257_v18  ;;  %s2498_s16 = scalar_lea.vmem %s2497_s10, 512  ;;  %p2499_p1 = scmp.lt.s32.totalorder %s3059_s9, %s2497_s10 }
  0xaf   : > { %2032 = vmatprep.subr.bf16.mxu1 %v2580_v1  ;;  %p2494_p5 = pnand %p2493_p0, %p3130_p2  ;;  %p2500_p11 = scmp.lt.s32.totalorder %s2498_s16, %s2492_s13 }
  0xb1   : > { %609 = vmatpush1.bf16.msra.mxu0 %v2244_v13  ;;  %p2495_p10 = pneg %p2494_p5  ;;  %p2501_p12 = por %p2500_p11, %p2499_p1 }
  0xb2   : > { %610 = vmatprep.subr.bf16.mxu0 %v2245_v14  ;;  %2033 = vmatpush3.bf16.msra.mxu1 %v2258_v21 }
  0xb3   : > { %2034 = vmatprep.subr.bf16.mxu1 %v2580_v1  ;;  %p2502_p13 = pnand %p2501_p12, %p2495_p10 }
  0xb5   : > { %611 = vmatpush1.bf16.msra.mxu0 %v2247_v15 }
  0xb6   : > { %612 = vmatprep.subr.bf16.mxu0 %v2248_v16  ;;  %2035 = vmatpush3.bf16.msra.mxu1 %v2259_v25 }
  0xb7   : > { %2036 = vmatprep.subr.bf16.mxu1 %v2580_v1 }
  0xb9   : > { %613 = vmatpush1.bf16.msra.mxu0 %v2250_v19 }
  0xba   : > { %614 = vmatprep.subr.bf16.mxu0 %v2251_v20  ;;  %2037 = vmatpush3.bf16.msra.mxu1 %v2260_v27 }
  0xbb   : > { %2038 = vmatprep.subr.bf16.mxu1 %v2580_v1 }
  0xbd   : > { %615 = vmatpush1.bf16.msra.mxu0 %v2253_v22 }
  0xbe   : > { %2068 = vmatprep.subr.bf16.mxu0 %v2580_v1  ;;  %2039 = vmatpush3.bf16.msra.mxu1 %v2261_v28 }
  0xbf   : > { %2044 = vmatprep.subr.bf16.mxu1 %v2580_v1 }
  0xc0   : > { %633 = vmatmul.mubr.bf16.vlgmr.msra.gmra.mrb[0].mxu0 %v422_v26 }
  0xc1   : > { %2070 = vmatprep.mubr.msk.bf16.mxu0 %vm2581_vm0, %v2580_v1  ;;  %2041 = vmatmul.mubr.bf16.vlgmr.msra.gmra.mrb[0].mxu1 %v422_v26 }
  0xc2   : > { %2046 = vmatprep.mubr.msk.bf16.mxu1 %vm2581_vm0, %v2580_v1 }
 0x193   : > { %v634_v35 = vpop.f32.mrb[0].mxu0 }
 0x194   : > { %v635_v37 = vadd.f32 %v634_v35, %v460_v34  ;;  %v636_v38 = vpop.f32.mrb[1].mxu0  ;;  %v677_v51 = vpop.f32.mrb[0].mxu1 }
 0x195   : > { %v638_v39 = vpop.f32.mrb[2].mxu0  ;;  %v637_v42 = vadd.f32 %v636_v38, %v464_v36  ;;  %v678_v52 = vadd.f32 %v677_v51, %v468_v50  ;;  %v2042_v53 = vpop.f32.mrb[1].mxu1 }
 0x196   : > { %v639_v40 = vadd.f32 %v638_v39, %v460_v34  ;;  %v640_v41 = vpop.f32.mrb[3].mxu0  ;;  %v684_v44 = vmul.f32 0.17677669, %v635_v37  ;;  %v680_v54 = vpop.f32.mrb[2].mxu1 }
 0x197   : > { %v641_v43 = vadd.f32 %v640_v41, %v464_v36  ;;  %v681_v55 = vadd.f32 %v680_v54, %v468_v50  ;;  %v2043_v56 = vpop.f32.mrb[3].mxu1 }
 0x198   : > { %v685_v45 = vmul.f32 0.17677669, %v639_v40 }
 0x199   : > { %v687_v46 = vpack.c.bf16 %v641_v43, %v637_v42  ;;  %v2913_v57 = vpack.c.bf16 %v681_v55, %v678_v52 }
 0x19a   : > { %v686_v47 = vpack.c.bf16 %v685_v45, %v684_v44 }
 0x19b   : > { %v700_v48 = vsel %vm695_vm1, %v687_v46, 0 }
 0x19c   : > { %2045 = vmatpush3.bf16.xpose.msra.mxu1 %v700_v48 }
 0x19d   : > { %2050 = vmatprep.subr.bf16.mxu1 %v2580_v1 }
 0x1a3   : > { %2047 = vmatmul.mubr.msk.bf16.vlgmr.msra.gmra.mrb[4].mxu1 %vm695_vm1, %v686_v47 }
 0x1a4   : > { %2052 = vmatprep.mubr.msk.bf16.mxu1 %vm2581_vm0, %v2580_v1  ;;  %2051 = vmatpush3.bf16.msra.mxu1 %v2913_v57 }
 0x1a5   : > { %2056 = vmatprep.subr.bf16.mxu1 %v2580_v1 }
 0x276   : > { %v736_v59 = vpop.f32.mrb[4].mxu1 }
 0x277   : > { %v737_v60 = vadd.f32 %v2919_v58, %v736_v59  ;;  %v2048_v61 = vpop.f32.mrb[5].mxu1 }
 0x278   : > { %v739_v62 = vpop.f32.mrb[6].mxu1 }
 0x279   : > { %v740_v63 = vadd.f32 %v2919_v58, %v739_v62  ;;  %v2049_v2 = vpop.f32.mrb[7].mxu1  ;;  %v744_v3 = vsel %vm743_vm2, %v737_v60, -inf }
 0x27a   : > { %745 = vmax.xlane.f32.xlu0 %v744_v3 }
 0x27b   : > { %v747_v4 = vsel %vm743_vm2, %v740_v63, -inf }
 0x27e   : > { %748 = vmax.xlane.f32.xlu0 %v747_v4 }
 0x294   : > { %815 = vrot.lane.b32.xlu0 %v687_v46, %s2582_s25 }
 0x298   : > { %1058 = vrot.lane.b32.xlu0 %v687_v46, %s2583_s26 }
 0x307   : > { %v746_v5 = vpop.xlane.xlu0 %745 }
 0x308   : > { %v750_v6 = vsub.f32 %v737_v60, %v746_v5 }
 0x30a   : > { %v752_v7 = vmul.f32 1.442695, %v750_v6 }
 0x30b   : > { %v749_v8 = vpop.xlane.xlu0 %748 }
 0x30c   : > { %2310 = vpow2.f32 %v752_v7  ;;  %v751_v9 = vsub.f32 %v740_v63, %v749_v8 }
 0x30e   : > { %v754_v10 = vmul.f32 1.442695, %v751_v9 }
 0x30f   : > { %v816_v18 = vpop.permute.xlu0 %815 }
 0x310   : > { %2312 = vpow2.f32 %v754_v10  ;;  %v821_v29 = vsel %vm695_vm1, %v816_v18, 0 }
 0x313   : > { %v1059_v27 = vpop.permute.xlu0 %1058 }
 0x314   : > { %v1064_v34 = vsel %vm695_vm1, %v1059_v27, 0 }
 0x316   : > { %v2311_v11 = vpop.eup %2310 }
 0x317   : > { %v756_v12 = vsel %vm743_vm2, %v2311_v11, 0.0 }
 0x318   : > { %757 = vadd.xlane.f32.xlu1 %v756_v12 }
 0x31a   : > { %v2313_v13 = vpop.eup %2312 }
 0x31b   : > { %v759_v14 = vsel %vm743_vm2, %v2313_v13, 0.0 }
 0x31c   : > { %760 = vadd.xlane.f32.xlu1 %v759_v14 }
 0x32d   : > { %812 = vrot.lane.b32.xlu1 %v686_v47, %s2582_s25 }
 0x331   : > { %937 = vrot.lane.b32.xlu1 %v687_v46, %s2584_s22 }
 0x335   : > { %935 = vrot.lane.b32.xlu1 %v686_v47, %s2584_s22 }
 0x339   : > { %1056 = vrot.lane.b32.xlu1 %v686_v47, %s2583_s26 }
 0x3a5   : > { %v758_v15 = vpop.xlane.xlu1 %757 }
 0x3a6   : > { %2314 = vrcp.f32 %v758_v15 }
 0x3a9   : > { %v761_v16 = vpop.xlane.xlu1 %760 }
 0x3aa   : > { %2316 = vrcp.f32 %v761_v16 }
 0x3ad   : > { %v813_v17 = vpop.permute.xlu1 %812 }
 0x3b0   : > { %v2315_v20 = vpop.eup %2314 }
 0x3b1   : > { %v938_v19 = vpop.permute.xlu1 %937  ;;  %v764_v25 = vmul.f32 %v2315_v20, %v2311_v11 }
 0x3b2   : > { %v943_v21 = vsel %vm695_vm1, %v938_v19, 0 }
 0x3b3   : > { %2069 = vmatpush3.bf16.xpose.msra.mxu0 %v943_v21 }
 0x3b4   : > { %v2317_v22 = vpop.eup %2316  ;;  %2080 = vmatprep.subr.bf16.mxu0 %v2580_v1 }
 0x3b5   : > { %v765_v26 = vmul.f32 %v2317_v22, %v2313_v13  ;;  %v936_v32 = vpop.permute.xlu1 %935 }
 0x3b7   : > { %v766_v28 = vpack.c.bf16 %v765_v26, %v764_v25 }
 0x3b9   : > { %2053 = vmatmul.mubr.msk.bf16.vlgmr.msra.gmra.mrb[8].mxu1 %vm743_vm2, %v766_v28  ;;  %v1057_v35 = vpop.permute.xlu1 %1056 }
 0x3ba   : > { %2057 = vmatpush3.bf16.xpose.msra.mxu1 %v821_v29  ;;  %2071 = vmatmul.mubr.msk.bf16.vlgmr.msra.gmra.mrb[4].mxu0 %vm695_vm1, %v936_v32 }
 0x3bb   : > { %2081 = vmatpush3.bf16.xpose.msra.mxu0 %v1064_v34  ;;  %2058 = vmatprep.mubr.msk.bf16.mxu1 %vm2581_vm0, %v2580_v1 }
 0x3bc   : > { %2082 = vmatprep.mubr.msk.bf16.mxu0 %vm2581_vm0, %v2580_v1  ;;  %2062 = vmatprep.subr.bf16.mxu1 %v2580_v1 }
 0x3bd   : > { %2092 = vmatprep.subr.bf16.mxu0 %v2580_v1 }
 0x3c1   : > { %2059 = vmatmul.mubr.msk.bf16.vlgmr.msra.gmra.mrb[12].mxu1 %vm695_vm1, %v813_v17 }
 0x3c2   : > { %2083 = vmatmul.mubr.msk.bf16.vlgmr.msra.gmra.mrb[8].mxu0 %vm695_vm1, %v1057_v35  ;;  %2064 = vmatprep.mubr.msk.bf16.mxu1 %vm2581_vm0, %v2580_v1 }
 0x3c3   : > { %2108 = vmatprep.mubr.msk.bf16.mxu0 %vm2581_vm0, %v2580_v1 }
 0x48c   : > { %v2951_v36 = vpop.f32.mrb[8].mxu1 }
 0x48d   : > { %v2054_v37 = vpop.f32.mrb[9].mxu1  ;;  %v979_v38 = vpop.f32.mrb[4].mxu0 }
 0x48e   : > { %v2953_v39 = vpop.f32.mrb[10].mxu1  ;;  %v2072_v40 = vpop.f32.mrb[5].mxu0  ;;  %v980_v50 = vadd.f32 %v2919_v58, %v979_v38 }
 0x48f   : > { %v2055_v41 = vpop.f32.mrb[11].mxu1  ;;  %v982_v42 = vpop.f32.mrb[6].mxu0 }
 0x490   : > { %v2073_v43 = vpop.f32.mrb[7].mxu0  ;;  %v983_v60 = vadd.f32 %v2919_v58, %v982_v42  ;;  %v986_v61 = vsel %vm743_vm2, %v980_v50, -inf }
 0x492   : > { %v989_v2 = vsel %vm743_vm2, %v983_v60, -inf }
 0x494   : > { %v857_v44 = vpop.f32.mrb[12].mxu1 }
 0x495   : > { %v858_v45 = vadd.f32 %v2919_v58, %v857_v44  ;;  %v2060_v46 = vpop.f32.mrb[13].mxu1  ;;  %v1100_v47 = vpop.f32.mrb[8].mxu0 }
 0x496   : > { %v860_v48 = vpop.f32.mrb[14].mxu1  ;;  %v2084_v49 = vpop.f32.mrb[9].mxu0  ;;  %v1101_v63 = vadd.f32 %v2919_v58, %v1100_v47 }
 0x497   : > { %v861_v51 = vadd.f32 %v2919_v58, %v860_v48  ;;  %v2061_v52 = vpop.f32.mrb[15].mxu1  ;;  %v1103_v53 = vpop.f32.mrb[10].mxu0  ;;  %v864_v54 = vsel %vm743_vm2, %v858_v45, -inf }
 0x498   : > { %v2085_v55 = vpop.f32.mrb[11].mxu0  ;;  %865 = vmax.xlane.f32.xlu0 %v864_v54  ;;  %v1104_v56 = vadd.f32 %v2919_v58, %v1103_v53  ;;  %v1107_v3 = vsel %vm743_vm2, %v1101_v63, -inf }
 0x499   : > { %v867_v59 = vsel %vm743_vm2, %v861_v51, -inf }
 0x49a   : > { %868 = vmax.xlane.f32.xlu1 %v867_v59  ;;  %v1110_v62 = vsel %vm743_vm2, %v1104_v56, -inf }
 0x49c   : > { %987 = vmax.xlane.f32.xlu0 %v986_v61 }
 0x49e   : > { %1111 = vmax.xlane.f32.xlu1 %v1110_v62 }
 0x4a0   : > { %990 = vmax.xlane.f32.xlu0 %v989_v2 }
 0x4a4   : > { %1108 = vmax.xlane.f32.xlu0 %v1107_v3  ;;  %v2262_v3 = vld [vmem:[#allocation7] sm:$0xff]  }
 0x4a5   : > { %2093 = vmatpush3.bf16.msra.mxu0 %v2262_v3  ;;  %v2278_v3 = vld [vmem:[#allocation8 + $0x24] ss:$8 sps:$4 sm:$0xff]  }
 0x4a6   : > { %2094 = vmatprep.subr.bf16.mxu0 %v2580_v1 }
 0x525   : > { %v866_v4 = vpop.xlane.xlu0 %865 }
 0x526   : > { %v870_v13 = vsub.f32 %v858_v45, %v866_v4  ;;  %v2263_v4 = vld [vmem:[#allocation7 + $0x8] sm:$0xff]  }
 0x527   : > { %v869_v5 = vpop.xlane.xlu1 %868  ;;  %2095 = vmatpush3.bf16.msra.mxu0 %v2263_v4  ;;  %v2276_v4 = vld [vmem:[#allocation8 + $0x20] ss:$8 sps:$4 sm:$0xff]  }
 0x528   : > { %v871_v14 = vsub.f32 %v861_v51, %v869_v5  ;;  %v872_v18 = vmul.f32 1.442695, %v870_v13  ;;  %v2264_v5 = vld [vmem:[#allocation7 + $0x10] sm:$0xff]   ;;  %2096 = vmatprep.subr.bf16.mxu0 %v2580_v1 }
 0x529   : > { %v988_v6 = vpop.xlane.xlu0 %987  ;;  %v2268_v13 = vld [vmem:[#allocation7 + $0x30] sm:$0xff]  }
 0x52a   : > { %v992_v7 = vsub.f32 %v980_v50, %v988_v6  ;;  %v874_v19 = vmul.f32 1.442695, %v871_v14  ;;  %v2265_v6 = vld [vmem:[#allocation7 + $0x18] sm:$0xff]  }
 0x52b   : > { %v1112_v8 = vpop.xlane.xlu1 %1111  ;;  %2097 = vmatpush3.bf16.msra.mxu0 %v2264_v5  ;;  %v2279_v5 = vld [vmem:[#allocation8 + $0x30] ss:$8 sps:$4 sm:$0xff]  }
 0x52c   : > { %v994_v9 = vmul.f32 1.442695, %v992_v7  ;;  %v1114_v10 = vsub.f32 %v1104_v56, %v1112_v8  ;;  %2098 = vmatprep.subr.bf16.mxu0 %v2580_v1  ;;  %v2266_v7 = vld [vmem:[#allocation7 + $0x20] sm:$0xff]  }
 0x52d   : > { %v991_v11 = vpop.xlane.xlu0 %990 }
 0x52e   : > { %2318 = vpow2.f32 %v994_v9  ;;  %v993_v12 = vsub.f32 %v983_v60, %v991_v11  ;;  %v1117_v15 = vmul.f32 1.442695, %v1114_v10  ;;  %v2267_v9 = vld [vmem:[#allocation7 + $0x28] sm:$0xff]  }
 0x52f   : > { %2099 = vmatpush3.bf16.msra.mxu0 %v2265_v6  ;;  %v2281_v6 = vld [vmem:[#allocation8 + $0x34] ss:$8 sps:$4 sm:$0xff]  }
 0x530   : > { %v996_v58 = vmul.f32 1.442695, %v993_v12  ;;  %2100 = vmatprep.subr.bf16.mxu0 %v2580_v1 }
 0x531   : > { %v1109_v16 = vpop.xlane.xlu0 %1108 }
 0x532   : > { %2320 = vpow2.f32 %v996_v58  ;;  %v1113_v17 = vsub.f32 %v1101_v63, %v1109_v16  ;;  %v2269_v58 = vld [vmem:[#allocation7 + $0x38] sm:$0xff]  }
 0x533   : > { %2322 = vpow2.f32 %v1117_v15  ;;  %2101 = vmatpush3.bf16.msra.mxu0 %v2266_v7  ;;  %v420_v7 = vld [vmem:[%s415_s23] sm:$0xff] }
 0x534   : > { %v1115_v20 = vmul.f32 1.442695, %v1113_v17  ;;  %2102 = vmatprep.subr.bf16.mxu0 %v2580_v1 }
 0x536   : > { %2324 = vpow2.f32 %v1115_v20 }
 0x537   : > { %2326 = vpow2.f32 %v872_v18  ;;  %2103 = vmatpush3.bf16.msra.mxu0 %v2267_v9  ;;  %v2287_v9 = vld [vmem:[#allocation8 + $0x54] ss:$8 sps:$4 sm:$0xff]  }
 0x538   : > { %v2319_v21 = vpop.eup %2318  ;;  %2328 = vpow2.f32 %v874_v19  ;;  %2104 = vmatprep.subr.bf16.mxu0 %v2580_v1 }
 0x539   : > { %v998_v22 = vsel %vm743_vm2, %v2319_v21, 0.0 }
 0x53a   : > { %999 = vadd.xlane.f32.xlu0 %v998_v22 }
 0x53b   : > { %2105 = vmatpush3.bf16.msra.mxu0 %v2268_v13  ;;  %v2293_v13 = vld [vmem:[#allocation8 + $0x74] ss:$8 sps:$4 sm:$0xff]  }
 0x53c   : > { %v2321_v25 = vpop.eup %2320  ;;  %2106 = vmatprep.subr.bf16.mxu0 %v2580_v1 }
 0x53d   : > { %v1001_v26 = vsel %vm743_vm2, %v2321_v25, 0.0  ;;  %v2323_v27 = vpop.eup %2322 }
 0x53e   : > { %1002 = vadd.xlane.f32.xlu1 %v1001_v26  ;;  %v1122_v34 = vsel %vm743_vm2, %v2323_v27, 0.0 }
 0x53f   : > { %2107 = vmatpush3.bf16.msra.mxu0 %v2269_v58  ;;  %v2295_v58 = vld [vmem:[#allocation10] sm:$0xff]  }
 0x540   : > { %v2325_v28 = vpop.eup %2324 }
 0x541   : > { %v2327_v29 = vpop.eup %2326  ;;  %v1119_v32 = vsel %vm743_vm2, %v2325_v28, 0.0 }
 0x542   : > { %v2329_v35 = vpop.eup %2328  ;;  %1120 = vadd.xlane.f32.xlu0 %v1119_v32  ;;  %1123 = vadd.xlane.f32.xlu1 %v1122_v34  ;;  %v876_v37 = vsel %vm743_vm2, %v2327_v29, 0.0 }
 0x543   : > { %v879_v38 = vsel %vm743_vm2, %v2329_v35, 0.0 }
 0x546   : > { %877 = vadd.xlane.f32.xlu0 %v876_v37  ;;  %880 = vadd.xlane.f32.xlu1 %v879_v38 }
 0x557   : > { %1009 = vrot.lane.b32.xlu1 %v2913_v57, %s2584_s22 }
 0x55b   : > { %1130 = vrot.lane.b32.xlu1 %v2913_v57, %s2583_s26 }
 0x55c   : > { %888 = vrot.lane.b32.xlu0 %v2913_v57, %s2582_s25 }
 0x5c7   : > { %v1000_v40 = vpop.xlane.xlu0 %999 }
 0x5cb   : > { %v1003_v41 = vpop.xlane.xlu1 %1002 }
 0x5cf   : > { %v1121_v42 = vpop.xlane.xlu0 %1120  ;;  %v1124_v43 = vpop.xlane.xlu1 %1123 }
 0x5d3   : > { %v878_v44 = vpop.xlane.xlu0 %877  ;;  %v881_v45 = vpop.xlane.xlu1 %880 }
 0x5d4   : > { %2330 = vrcp.f32 %v878_v44 }
 0x5d5   : > { %2332 = vrcp.f32 %v881_v45 }
 0x5d6   : > { %2334 = vrcp.f32 %v1003_v41 }
 0x5d7   : > { %v889_v46 = vpop.permute.xlu0 %888  ;;  %2336 = vrcp.f32 %v1000_v40  ;;  %v1010_v52 = vpop.permute.xlu1 %1009 }
 0x5d8   : > { %2063 = vmatpush3.bf16.msra.mxu1 %v889_v46  ;;  %2338 = vrcp.f32 %v1121_v42  ;;  %v1226_v46 = vld [vmem:[%s3111_s7 + $0x1] ss:$0 sm:$0xff] }
 0x5d9   : > { %2074 = vmatprep.subr.bf16.mxu1 %v2580_v1  ;;  %2340 = vrcp.f32 %v1124_v43 }
 0x5db   : > { %v1131_v61 = vpop.permute.xlu1 %1130 }
 0x5de   : > { %v2331_v47 = vpop.eup %2330 }
 0x5df   : > { %v2333_v48 = vpop.eup %2332  ;;  %v884_v49 = vmul.f32 %v2331_v47, %v2327_v29 }
 0x5e0   : > { %v885_v50 = vmul.f32 %v2333_v48, %v2329_v35  ;;  %v2335_v51 = vpop.eup %2334 }
 0x5e1   : > { %v2337_v53 = vpop.eup %2336  ;;  %v1007_v54 = vmul.f32 %v2335_v51, %v2321_v25 }
 0x5e2   : > { %v886_v57 = vpack.c.bf16 %v885_v50, %v884_v49  ;;  %v1006_v55 = vmul.f32 %v2337_v53, %v2319_v21  ;;  %v2339_v56 = vpop.eup %2338  ;;  %v2270_v53 = vld [vmem:[#allocation8] ss:$8 sps:$4 sm:$0xff]  }
 0x5e3   : > { %v2341_v60 = vpop.eup %2340  ;;  %v1127_v62 = vmul.f32 %v2339_v56, %v2325_v28 }
 0x5e4   : > { %2065 = vmatmul.mubr.msk.bf16.vlgmr.msra.gmra.mrb[16].mxu1 %vm743_vm2, %v886_v57  ;;  %v1008_v59 = vpack.c.bf16 %v1007_v54, %v1006_v55  ;;  %v1128_v63 = vmul.f32 %v2341_v60, %v2323_v27  ;;  %v2272_v54 = vld [vmem:[#allocation8 + $0x4] ss:$8 sps:$4 sm:$0xff]  }
 0x5e5   : > { %2075 = vmatpush3.bf16.msra.mxu1 %v1010_v52  ;;  %2076 = vmatprep.mubr.msk.bf16.mxu1 %vm2581_vm0, %v2580_v1  ;;  %v421_v52 = vld [vmem:[%s415_s23 + $0x8] sm:$0xff] }
 0x5e6   : > { %2086 = vmatprep.subr.bf16.mxu1 %v2580_v1  ;;  %v1129_v2 = vpack.c.bf16 %v1128_v63, %v1127_v62  ;;  %v2275_v63 = vld [vmem:[#allocation8 + $0x14] ss:$8 sps:$4 sm:$0xff]  }
 0x5ec   : > { %2077 = vmatmul.mubr.msk.bf16.vlgmr.msra.gmra.mrb[20].mxu1 %vm743_vm2, %v1008_v59 }
 0x5ed   : > { %2087 = vmatpush3.bf16.msra.mxu1 %v1131_v61  ;;  %2088 = vmatprep.mubr.msk.bf16.mxu1 %vm2581_vm0, %v2580_v1 }
 0x5ee   : > { %1469 = vmatprep.subr.bf16.mxu1 %v2272_v54  ;;  %v1927_v54 = vld [vmem:[%s3111_s7 + $0x4] ss:$8 sm:$0x3] }
 0x5f4   : > { %2089 = vmatmul.mubr.msk.bf16.vlgmr.msra.gmra.mrb[24].mxu1 %vm743_vm2, %v1129_v2  ;;  %v2273_v2 = vld [vmem:[#allocation8 + $0x10] ss:$8 sps:$4 sm:$0xff]  }
 0x5f5   : > { %1501 = vmatprep.mubr.bf16.mxu1 %v2579_v0  ;;  %1470 = vmatpush1.bf16.msra.mxu1 %v2270_v53  ;;  %v2309_v53 = vld [vmem:[#allocation10 + $0x38] sm:$0xff]  }
 0x5f6   : > { %1471 = vmatprep.subr.bf16.mxu1 %v2275_v63 }
 0x5f9   : > { %1472 = vmatpush1.bf16.msra.mxu1 %v2273_v2 }
 0x5fa   : > { %1473 = vmatprep.subr.bf16.mxu1 %v2278_v3 }
 0x5fd   : > { %1474 = vmatpush1.bf16.msra.mxu1 %v2276_v4 }
 0x5fe   : > { %1475 = vmatprep.subr.bf16.mxu1 %v2281_v6 }
 0x601   : > { %1476 = vmatpush1.bf16.msra.mxu1 %v2279_v5 }
 0x6b7   : > { %v928_v8 = vpop.f32.mrb[16].mxu1 }
 0x6b8   : > { %v2066_v0 = vpop.f32.mrb[17].mxu1 }
 0x6b9   : > { %v931_v10 = vpop.f32.mrb[18].mxu1  ;;  %v2282_v0 = vld [vmem:[#allocation8 + $0x40] ss:$8 sps:$4 sm:$0xff]  }
 0x6ba   : > { %v2213_v11 = vpack.i.bf16 %v931_v10, %v928_v8  ;;  %v2067_v12 = vpop.f32.mrb[19].mxu1  ;;  %v2284_v8 = vld [vmem:[#allocation8 + $0x44] ss:$8 sps:$4 sm:$0xff]   ;;  %v2285_v10 = vld [vmem:[#allocation8 + $0x50] ss:$8 sps:$4 sm:$0xff]  }
 0x6bb   : > { %1477 = vmatprep.subr.bf16.mxu1 %v2284_v8  ;;  %v2288_v12 = vld [vmem:[#allocation8 + $0x60] ss:$8 sps:$4 sm:$0xff]  }
 0x6bc   : > { %2214 = vrot.lane.b32.xlu1 %v2213_v11, %s2583_s26  ;;  %1478 = vmatpush1.bf16.msra.mxu1 %v2282_v0  ;;  %v2290_v11 = vld [vmem:[#allocation8 + $0x64] ss:$8 sps:$4 sm:$0xff]  }
 0x6bd   : > { %1479 = vmatprep.subr.bf16.mxu1 %v2287_v9 }
 0x6bf   : > { %v1049_v14 = vpop.f32.mrb[20].mxu1 }
 0x6c0   : > { %v2078_v15 = vpop.f32.mrb[21].mxu1  ;;  %1480 = vmatpush1.bf16.msra.mxu1 %v2285_v10 }
 0x6c1   : > { %v1052_v16 = vpop.f32.mrb[22].mxu1  ;;  %1481 = vmatprep.subr.bf16.mxu1 %v2290_v11  ;;  %v2294_v15 = vld [vmem:[#allocation10 + $0x40] sm:$0xff]  }
 0x6c2   : > { %v2218_v17 = vpack.i.bf16 %v1052_v16, %v1049_v14  ;;  %v2079_v18 = vpop.f32.mrb[23].mxu1  ;;  %v2291_v14 = vld [vmem:[#allocation8 + $0x70] ss:$8 sps:$4 sm:$0xff]   ;;  %v2296_v16 = vld [vmem:[#allocation10 + $0x48] sm:$0xff]   ;;  %2002 = vmatprep.subr.bf16.mxu0 %v2294_v15 }
 0x6c3   : > { %v2298_v18 = vld [vmem:[#allocation10 + $0x50] sm:$0xff]  }
 0x6c4   : > { %2219 = vrot.lane.b32.xlu0 %v2218_v17, %s2584_s22  ;;  %1482 = vmatpush1.bf16.msra.mxu1 %v2288_v12  ;;  %v2297_v17 = vld [vmem:[#allocation10 + $0x8] sm:$0xff]   ;;  %s3057_s22 = scalar_lea.hbm %s3112_s8, %s1967_s14 }
 0x6c5   : > { %1483 = vmatprep.subr.bf16.mxu1 %v2293_v13 }
 0x6c7   : > { %v1170_v19 = vpop.f32.mrb[24].mxu1 }
 0x6c8   : > { %v2090_v20 = vpop.f32.mrb[25].mxu1  ;;  %1484 = vmatpush1.bf16.msra.mxu1 %v2291_v14 }
 0x6c9   : > { %v1173_v21 = vpop.f32.mrb[26].mxu1  ;;  %v2300_v20 = vld [vmem:[#allocation10 + $0x58] sm:$0xff]  }
 0x6ca   : > { %v2223_v22 = vpack.i.bf16 %v1173_v21, %v1170_v19  ;;  %v2091_v25 = vpop.f32.mrb[27].mxu1  ;;  %v2299_v19 = vld [vmem:[#allocation10 + $0x10] sm:$0xff]   ;;  %v2301_v21 = vld [vmem:[#allocation10 + $0x18] sm:$0xff]  }
 0x6cb   : > { %v2303_v25 = vld [vmem:[#allocation10 + $0x20] sm:$0xff]  }
 0x6cc   : > { %2224 = vrot.lane.b32.xlu1 %v2223_v22, %s2582_s25  ;;  %v2302_v22 = vld [vmem:[#allocation10 + $0x60] sm:$0xff]  }
 0x72e   : > { %v2215_v26 = vpop.permute.xlu1 %2214 }
 0x72f   : > { %v2217_v28 = vunpack.i.h.bf16 %v2215_v26  ;;  %v2216_v29 = vunpack.i.l.bf16 %v2215_v26  ;;  %v2304_v26 = vld [vmem:[#allocation10 + $0x68] sm:$0xff]  }
 0x731   : > { %v1202_v35 = vsel %vm695_vm1, %v2953_v39, %v2217_v28  ;;  %v1201_v37 = vsel %vm695_vm1, %v2951_v36, %v2216_v29 }
 0x736   : > { %v2220_v27 = vpop.permute.xlu0 %2219 }
 0x737   : > { %v2222_v1 = vunpack.i.h.bf16 %v2220_v27  ;;  %v2221_v32 = vunpack.i.l.bf16 %v2220_v27 }
 0x739   : > { %v1205_v41 = vsel %vm1203_vm3, %v1202_v35, %v2222_v1  ;;  %v1204_v42 = vsel %vm1203_vm3, %v1201_v37, %v2221_v32  ;;  %v1341_v37 = vld [vmem:[%s3111_s7 + $0x2] ss:$0 sm:$0xff] }
 0x73e   : > { %v2225_v34 = vpop.permute.xlu1 %2224 }
 0x73f   : > { %v2227_v38 = vunpack.i.h.bf16 %v2225_v34  ;;  %v2226_v40 = vunpack.i.l.bf16 %v2225_v34 }
 0x741   : > { %v1208_v43 = vsel %vm1206_vm4, %v1205_v41, %v2227_v38  ;;  %v1207_v44 = vsel %vm1206_vm4, %v1204_v42, %v2226_v40  ;;  %v1344_v42 = vld [vmem:[%s3111_s7 + $0x3] ss:$0 sm:$0xff] }
 0x742   : > { %v1209_v45 = vpack.c.bf16 %v1208_v43, %v1207_v44 }
 0x744   : > { %2109 = vmatmul.mubr.bf16.vlgmr.msra.gmra.mrb[12].mxu0 %v1209_v45 }
 0x745   : > { %2003 = vmatpush3.bf16.msra.mxu0 %v2295_v58 }
 0x746   : > { %2004 = vmatprep.subr.bf16.mxu0 %v2296_v16 }
 0x749   : > { %2005 = vmatpush3.bf16.msra.mxu0 %v2297_v17 }
 0x74a   : > { %2006 = vmatprep.subr.bf16.mxu0 %v2298_v18 }
 0x74d   : > { %2007 = vmatpush3.bf16.msra.mxu0 %v2299_v19 }
 0x74e   : > { %2008 = vmatprep.subr.bf16.mxu0 %v2300_v20 }
 0x751   : > { %2009 = vmatpush3.bf16.msra.mxu0 %v2301_v21 }
 0x752   : > { %2010 = vmatprep.subr.bf16.mxu0 %v2302_v22 }
 0x755   : > { %2011 = vmatpush3.bf16.msra.mxu0 %v2303_v25 }
 0x756   : > { %2012 = vmatprep.subr.bf16.mxu0 %v2304_v26 }
 0x817   : > { %v1309_v47 = vpop.f32.mrb[12].mxu0 }
 0x818   : > { %v1310_v48 = vadd.f32 %v1309_v47, %v1226_v46  ;;  %v2110_v49 = vpop.f32.mrb[13].mxu0 }
 0x819   : > { %v1312_v39 = vpop.f32.mrb[14].mxu0 }
 0x81a   : > { %v1313_v50 = vadd.f32 %v1312_v39, %v1226_v46  ;;  %v2111_v57 = vpop.f32.mrb[15].mxu0  ;;  %v1316_v36 = vadd.f32 %v1310_v48, %v2878_v23 }
 0x81b   : > { %v2305_v57 = vld [vmem:[#allocation10 + $0x28] sm:$0xff]  }
 0x81c   : > { %1318 = vadd.xlane.f32.xlu0 %v1316_v36  ;;  %v1317_v51 = vadd.f32 %v1313_v50, %v2880_v24  ;;  %2013 = vmatpush3.bf16.msra.mxu0 %v2305_v57 }
 0x81e   : > { %1320 = vadd.xlane.f32.xlu1 %v1317_v51 }
 0x82f   : > { %1354 = vperm.xlu1 %2229, %v421_v52   ;;  %v2308_v52 = vld [vmem:[#allocation10 + $0x78] sm:$0xff]  }
 0x8a9   : > { %v1319_v55 = vpop.xlane.xlu0 %1318 }
 0x8aa   : > { %v1323_v56 = vmul.f32 0.0078125, %v1319_v55  ;;  %v1382_v55 = vrot.slane %v1927_v54, %v459_v31 }
 0x8ab   : > { %v1321_v59 = vpop.xlane.xlu1 %1320 }
 0x8ac   : > { %v3013_v60 = vsub.f32 %v1316_v36, %v1323_v56  ;;  %v1324_v23 = vmul.f32 0.0078125, %v1321_v59  ;;  %v2306_v36 = vld [vmem:[#allocation10 + $0x70] sm:$0xff]   ;;  %v1386_v56 = vrot.slane %v1927_v54, %v463_v33 }
 0x8ad   : > { %2014 = vmatprep.subr.bf16.mxu0 %v2306_v36 }
 0x8ae   : > { %v3015_v61 = vsub.f32 %v1317_v51, %v1324_v23  ;;  %v1327_v24 = vmul.f32 %v3013_v60, %v3013_v60  ;;  %v2307_v51 = vld [vmem:[#allocation10 + $0x30] sm:$0xff]  }
 0x8af   : > { %v3031_v47 = vpop.permute.xlu1 %1354  ;;  %2015 = vmatpush3.bf16.msra.mxu0 %v2307_v51 }
 0x8b0   : > { %1329 = vadd.xlane.f32.xlu0 %v1327_v24  ;;  %v1328_v62 = vmul.f32 %v3015_v61, %v3015_v61  ;;  %2016 = vmatprep.subr.bf16.mxu0 %v2308_v52 }
 0x8b3   : > { %2017 = vmatpush3.bf16.msra.mxu0 %v2309_v53 }
 0x8b4   : > { %1331 = vadd.xlane.f32.xlu0 %v1328_v62 }
 0x8ca   : > { %1349 = vperm.xlu0 %2228, %v420_v7  }
 0x93d   : > { %v1330_v27 = vpop.xlane.xlu0 %1329 }
 0x93e   : > { %v1333_v28 = vmul.f32 0.0078125, %v1330_v27 }
 0x940   : > { %v1335_v29 = vadd.f32 1e-05, %v1333_v28 }
 0x941   : > { %v1332_v1 = vpop.xlane.xlu0 %1331 }
 0x942   : > { %2342 = vrsqrt.f32 %v1335_v29  ;;  %v1334_v32 = vmul.f32 0.0078125, %v1332_v1 }
 0x944   : > { %v1336_v34 = vadd.f32 1e-05, %v1334_v32 }
 0x946   : > { %2344 = vrsqrt.f32 %v1336_v34  ;;  %v1712_v34 = vld [vmem:[%s3111_s7 + $0x6] ss:$0 sm:$0xff] }
 0x949   : > { %v3029_v46 = vpop.permute.xlu0 %1349 }
 0x94c   : > { %v2343_v35 = vpop.eup %2342 }
 0x94d   : > { %v1339_v38 = vmul.f32 %v2343_v35, %v3013_v60 }
 0x94f   : > { %v1342_v40 = vmul.f32 %v1341_v37, %v1339_v38 }
 0x950   : > { %v2345_v41 = vpop.eup %2344 }
 0x951   : > { %v1340_v43 = vmul.f32 %v2345_v41, %v3015_v61  ;;  %v1345_v44 = vadd.f32 %v1344_v42, %v1342_v40 }
 0x953   : > { %v1343_v45 = vmul.f32 %v1341_v37, %v1340_v43  ;;  %v1357_v49 = vmul.f32 %v3029_v46, %v1345_v44  ;;  %v1715_v37 = vld [vmem:[%s3111_s7 + $0x7] ss:$0 sm:$0xff] }
 0x955   : > { %v1346_v48 = vadd.f32 %v1344_v42, %v1343_v45 }
 0x957   : > { %v1358_v39 = vmul.f32 %v3031_v47, %v1346_v48 }
 0x959   : > { %v1359_v50 = vpack.c.bf16 %v1358_v39, %v1357_v49 }
 0x95b   : > { %1502 = vmatmul.mubr.bf16.vlgmr.msra.gmra.mrb[28].mxu1 %v1359_v50 }
 0xa2e   : > { %v1503_v59 = vpop.f32.mrb[28].mxu1 }
 0xa2f   : > { %v1504_v60 = vadd.f32 %v1503_v59, %v1382_v55  ;;  %v1505_v23 = vpop.f32.mrb[29].mxu1 }
 0xa30   : > { %v1506_v61 = vadd.f32 %v1505_v23, %v1386_v56  ;;  %v1507_v24 = vpop.f32.mrb[30].mxu1 }
 0xa31   : > { %v1508_v62 = vadd.f32 %v1507_v24, %v1382_v55  ;;  %v1509_v63 = vpop.f32.mrb[31].mxu1  ;;  %v1512_v3 = vmax.f32 %v1504_v60, 0.0 }
 0xa32   : > { %v1510_v2 = vadd.f32 %v1509_v63, %v1386_v56  ;;  %v1513_v5 = vmax.f32 %v1506_v61, 0.0 }
 0xa33   : > { %v1514_v4 = vmax.f32 %v1508_v62, 0.0 }
 0xa34   : > { %v1515_v6 = vmax.f32 %v1510_v2, 0.0 }
 0xa35   : > { %v1516_v7 = vpack.c.bf16 %v1514_v4, %v1512_v3 }
 0xa36   : > { %v1517_v8 = vpack.c.bf16 %v1515_v6, %v1513_v5 }
 0xa38   : > { %1679 = vmatprep.mubr.bf16.mxu0 %v1517_v8 }
 0xa39   : > { %1680 = vmatmul.mubr.bf16.vlgmr.msra.gmra.mrb[16].mxu0 %v1516_v7 }
 0xb0c   : > { %v2018_v31 = vpop.f32.mrb[16].mxu0 }
 0xb0d   : > { %v2019_v33 = vpop.f32.mrb[17].mxu0 }
 0xb0e   : > { %v2020_v0 = vadd.f32 %v2019_v33, %v2018_v31  ;;  %v2021_v9 = vpop.f32.mrb[18].mxu0 }
 0xb0f   : > { %v2022_v10 = vpop.f32.mrb[19].mxu0 }
 0xb10   : > { %v1682_v11 = vadd.f32 %v2020_v0, %v1550_v30  ;;  %v2023_v12 = vadd.f32 %v2022_v10, %v2021_v9 }
 0xb12   : > { %v1685_v13 = vadd.f32 %v2023_v12, %v1550_v30  ;;  %v1688_v14 = vadd.f32 %v1682_v11, %v1357_v49 }
 0xb14   : > { %1690 = vadd.xlane.f32.xlu1 %v1688_v14  ;;  %v1689_v15 = vadd.f32 %v1685_v13, %v1358_v39 }
 0xb16   : > { %1692 = vadd.xlane.f32.xlu0 %v1689_v15 }
 0xba1   : > { %v1691_v58 = vpop.xlane.xlu1 %1690 }
 0xba2   : > { %v1694_v16 = vmul.f32 0.0078125, %v1691_v58 }
 0xba3   : > { %v1693_v17 = vpop.xlane.xlu0 %1692 }
 0xba4   : > { %v1696_v18 = vsub.f32 %v1688_v14, %v1694_v16  ;;  %v1695_v19 = vmul.f32 0.0078125, %v1693_v17 }
 0xba6   : > { %v1697_v20 = vsub.f32 %v1689_v15, %v1695_v19  ;;  %v1698_v21 = vmul.f32 %v1696_v18, %v1696_v18 }
 0xba8   : > { %1700 = vadd.xlane.f32.xlu1 %v1698_v21  ;;  %v1699_v22 = vmul.f32 %v1697_v20, %v1697_v20 }
 0xbac   : > { %1702 = vadd.xlane.f32.xlu1 %v1699_v22 }
 0xc35   : > { %v1701_v25 = vpop.xlane.xlu1 %1700 }
 0xc36   : > { %v1704_v26 = vmul.f32 0.0078125, %v1701_v25 }
 0xc38   : > { %v1706_v27 = vadd.f32 1e-05, %v1704_v26 }
 0xc39   : > { %v1703_v28 = vpop.xlane.xlu1 %1702 }
 0xc3a   : > { %2346 = vrsqrt.f32 %v1706_v27  ;;  %v1705_v29 = vmul.f32 0.0078125, %v1703_v28 }
 0xc3c   : > { %v1707_v1 = vadd.f32 1e-05, %v1705_v29 }
 0xc3e   : > { %2348 = vrsqrt.f32 %v1707_v1 }
 0xc44   : > { %v2347_v32 = vpop.eup %2346 }
 0xc45   : > { %v1710_v35 = vmul.f32 %v2347_v32, %v1696_v18 }
 0xc47   : > { %v1713_v38 = vmul.f32 %v1712_v34, %v1710_v35 }
 0xc48   : > { %v2349_v40 = vpop.eup %2348 }
 0xc49   : > { %v1716_v41 = vadd.f32 %v1715_v37, %v1713_v38  ;;  %v1711_v42 = vmul.f32 %v2349_v40, %v1697_v20 }
 0xc4b   : > { %v1718_v43 = vmul.f32 %v1716_v41, %v3029_v46  ;;  %v1714_v44 = vmul.f32 %v1712_v34, %v1711_v42 }
 0xc4d   : > { %v1717_v45 = vadd.f32 %v1715_v37, %v1714_v44  ;;  %1720 = vst [vmem:[%s405_s18] sm:$0xff] %v1718_v43 }
 0xc4f   : > { %v1719_v48 = vmul.f32 %v1717_v45, %v3031_v47 }
 0xc51   : > { %1721 = vst [vmem:[%s405_s18 + $0x8] sm:$0xff] %v1719_v48 }
 0xc52   : > { %2505 = shalt.err (!%p2502_p13)
}
 0xc53   : > { %s2506_s23 = scalar_lea.hbm %s3057_s22, 256  ;;  %s2510_s18 = scalar_lea.hbm %s3112_s8, 512 }
 0xc54   : > { %p2507_p3 = scmp.ne.s32.totalorder %s3057_s22, %s2506_s23  ;;  %p2511_p4 = scmp.lt.u32.totalorder %s3057_s22, %s3112_s8 }
 0xc55   : > { %p2512_p8 = scmp.lt.u32.totalorder %s2510_s18, %s2506_s23  ;;  %p2514_p0 = scmp.lt.u32.totalorder %s2506_s23, %s3057_s22 }
 0xc56   : > { %p2508_p7 = pnand %p2507_p3, %p3130_p2 }
 0xc57   : > { %p2513_p6 = por %p2512_p8, %p2511_p4 }
 0xc58   : > { %p2509_p9 = pneg %p2508_p7 }
 0xc59   : > { %p2515_p5 = por %p2514_p0, %p2513_p6 }
 0xc5b   : > { %p2516_p10 = pnand %p2515_p5, %p2509_p9 }
 0xc5d   : > { %2519 = shalt.err (!%p2516_p10)
}
 0xc5e   : > { %s2586_s13 = smov 128   ;;  %s2587_s11 = smov 8  }
 0xc5f   : > { %2130 = dma.vmem_to_hbm [thread:$0]  (%p3130_p2), %s3059_s9, 256, %s3057_s22, %s1723_s17, %s2586_s13, %s2586_s13, %s2587_s11  }
 0xc60 PF: > { %s1751_s10 = sand.u32 1, %s2554_s27   ;;  %p3131_p1 = scmp.ne.s32.totalorder %s3123_s24, 0 }
 0xc61   : > { %p3132_p11 = scmp.ge.s32.totalorder %s2566_s30, 2  ;;  %s1752_s16 = scalar_lea.sflag [#allocation4], %s1751_s10 }
 0xc63   : > { %p2150_p12 = pnand %p3132_p11, %p3131_p1 }
 0xc65   : > { %2549 = dma.done.wait (!%p2150_p12), %s1752_s16, 256  }
 0xc66   : > { %2551 = vsyncadd (!%p2150_p12), %s1752_s16, 4294967040  ;;  %p23_p13 = scmp.ge.s32.totalorder %s2769_s15, 4   ;;  %s3133_s27 = smov %s2558_s28 }
 0xc67   : > { %s3134_s28 = smov %s2562_s29  ;;  %s3135_s29 = smov %s2780_s21 }
 0xc68   : > { %s3136_s30 = smov %s2769_s15  ;;  %25 = sbr.rel (!%p23_p13) target bundleno = 7 (0x7), region = 120 }
 0xc6f   :  { %1757 = vsyncpa [#allocation3], 1 }
 0xc70   :  { %1759 = vsyncpa [#allocation3 + $0x1], 1 }
 0xc71   :  { %1760 = vsyncpa [#allocation6], 1 }
 0xc72   :  { %1761 = vsyncpa [#allocation9], 1 }
 0xc73   :  { %1762 = vsyncpa [#allocation4], 1 }
 0xc74   :  { %1764 = vsyncpa [#allocation4 + $0x1], 1 }

</bundles_post_ra>
